<compile_context>
chip_gen: v6e
topology: v6e:2x2x1
jax: 0.10.0
libtpu: 0.0.40
codegen_flags: <defaults>
</compile_context>

<pallas_src>
import functools

import jax
import jax.numpy as jnp
import numpy as np
from jax.experimental import pallas as pl
from jax.experimental.pallas import tpu as pltpu

HIDDEN = 100          # hard-coded in the PyTorch module (self.hidden = 100)
HIDDEN_PAD = 128      # lane-aligned padding of the hidden dim
NUM_CLASSES = 3
BN_EPS = 1e-5         # PyTorch BatchNorm1d default
TILE_B = 8            # sublane-aligned batch tile (MXU M-dim >= 8)
GATE_ORDER = (0, 1, 3, 2)   # PyTorch rows are (i, f, g, o); pack as (i, f, o, g)


def lstm_classifier_kernel(x_ref, wih_ref, whh_ref, b_ref, wo_ref, bo_ref,
                           out_ref, gx_ref, *, seq_len, tile_b):
    """One batch tile per grid step; recurrence fully unrolled at trace time.

    x_ref   : (1, T*Bt, D)  time-major slab for this batch tile (f32)
    wih_ref : (D, 4*Hp)     fused input->gate weights, gate order (i,f,o,g) (f32)
    whh_ref : (Hp, 4*Hp)    fused hidden->gate weights, bf16, zero-padded
    b_ref   : (1, 4*Hp)     fused b_ih + b_hh (zero in padded lanes)
    wo_ref  : (Hp, 3)       output Linear with eval-BN of last timestep folded in
    bo_ref  : (1, 3)        folded output bias
    out_ref : (Bt, 3)
    gx_ref  : (T*Bt, 4*Hp)  VMEM scratch holding the hoisted input projection
    """
    Hp = whh_ref.shape[0]
    Bt = tile_b

    # --- Hoisted input projection + bias: ONE matmul for the whole sequence.
    #     M = T*Bt rows instead of Bt per step -> 8x better MXU occupancy for
    #     this work, and it is off the serial critical path.
    gx_ref[...] = (jnp.dot(x_ref[0], wih_ref[...],
                           preferred_element_type=jnp.float32)
                   + b_ref[...])

    h = jnp.zeros((Bt, Hp), jnp.float32)
    c = jnp.zeros((Bt, Hp), jnp.float32)

    # Static Python loop: seq_len is a trace-time constant, so every gx slice
    # is a free static sublane-aligned view; carried state is 2 vregs.
    # (Possible further micro-opt: stage W_hh once via pltpu.matmul_push_rhs /
    #  matmul_acc_lhs instead of re-streaming it every step.)
    for t in range(seq_len):
        # Per-step critical path: one bf16 MXU dot + activations.
        rec = jnp.dot(h.astype(jnp.bfloat16), whh_ref[...],
                      preferred_element_type=jnp.float32)          # (Bt, 4*Hp)
        gates = gx_ref[t * Bt:(t + 1) * Bt, :] + rec               # (Bt, 4*Hp)

        # Gate order (i, f, o, g): one sigmoid over a contiguous 3*Hp slab,
        # one tanh over the last Hp slab.
        sig = jax.nn.sigmoid(gates[:, :3 * Hp])
        g_g = jnp.tanh(gates[:, 3 * Hp:])
        i_g = sig[:, 0 * Hp:1 * Hp]
        f_g = sig[:, 1 * Hp:2 * Hp]
        o_g = sig[:, 2 * Hp:3 * Hp]

        c = f_g * c + i_g * g_g
        h = o_g * jnp.tanh(c)
        # Invariant: padded hidden lanes 100..127 stay EXACTLY zero because the
        # corresponding W_ih/W_hh rows+columns and bias lanes are exactly zero
        # (0.0 is exact in bf16), so g=tanh(0)=0 there and c/h never leave 0.

    # Head on the last timestep only: ReLU, then Linear with eval-BN pre-folded.
    y = jnp.maximum(h, 0.0)
    out_ref[...] = (jnp.dot(y, wo_ref[...], preferred_element_type=jnp.float32)
                    + bo_ref[...]).astype(out_ref.dtype)


def prepare_params(params, T):
    """Host-side, ONCE (outside jit): pack PyTorch-layout weights for the kernel."""
    H, Hp = HIDDEN, HIDDEN_PAD
    w_ih = np.asarray(params["w_ih"], np.float32)            # (4H, D) gates i,f,g,o
    w_hh = np.asarray(params["w_hh"], np.float32)            # (4H, H)
    bias = (np.asarray(params["b_ih"], np.float32)
            + np.asarray(params["b_hh"], np.float32))        # (4H,)
    w_out = np.asarray(params["w_out"], np.float32)           # (3, H)
    b_out = np.asarray(params["b_out"], np.float32)           # (3,)
    D = w_ih.shape[1]

    wih_big = np.zeros((D, 4 * Hp), np.float32)
    whh_big = np.zeros((Hp, 4 * Hp), np.float32)
    b_big = np.zeros((1, 4 * Hp), np.float32)
    for dst, src in enumerate(GATE_ORDER):                    # repack as (i,f,o,g)
        wih_big[:, dst * Hp:dst * Hp + H] = w_ih[src * H:(src + 1) * H, :].T
        whh_big[:H, dst * Hp:dst * Hp + H] = w_hh[src * H:(src + 1) * H, :].T
        b_big[0, dst * Hp:dst * Hp + H] = bias[src * H:(src + 1) * H]

    # Fold eval-mode BatchNorm1d (channel == last timestep) into the Linear:
    #   y = relu(h)*scale + shift;  y @ W^T + b
    #     = relu(h) @ (scale*W^T) + (b + shift * W.sum(axis=1))
    t_last = T - 1
    gamma = float(np.asarray(params["bn_gamma"])[t_last])
    beta = float(np.asarray(params["bn_beta"])[t_last])
    mean = float(np.asarray(params["bn_mean"])[t_last])
    var = float(np.asarray(params["bn_var"])[t_last])
    scale = gamma / np.sqrt(var + BN_EPS)
    shift = beta - mean * scale

    wo_fold = np.zeros((Hp, NUM_CLASSES), np.float32)
    wo_fold[:H, :] = (w_out * scale).T                                 # (H, 3)
    bo_fold = (b_out + shift * w_out.sum(axis=1)).reshape(1, NUM_CLASSES)

    return {
        "w_ih_big": jnp.asarray(wih_big),                              # f32
        "w_hh_big": jnp.asarray(whh_big, dtype=jnp.bfloat16),          # bf16 MXU operand
        "b_big": jnp.asarray(b_big),
        "w_out_fold": jnp.asarray(wo_fold),
        "b_out_fold": jnp.asarray(bo_fold),
        "seq_len": T,   # python int: BN fold is only valid for this sequence length
    }


def lstm_classifier_forward(x, packed):
    """x: (B, T, D) float32 (batch_first, like the PyTorch module)."""
    B, T, D = x.shape
    if packed["seq_len"] != T:
        raise ValueError("packed params were prepared for a different sequence "
                         "length; BatchNorm fold would be wrong. Re-pack.")
    Hp = HIDDEN_PAD

    # Pad batch to the 8-row sublane tile; extra rows ride the MXU pass free.
    Bp = ((B + TILE_B - 1) // TILE_B) * TILE_B
    nb = Bp // TILE_B
    x_p = jnp.zeros((Bp, T, D), jnp.float32).at[:B].set(x.astype(jnp.float32))
    # Per batch tile, lay out time-major (row = t*TILE_B + local_batch) so the
    # kernel's per-step gate rows are contiguous aligned sublane windows.
    x_tiles = (x_p.reshape(nb, TILE_B, T, D)
               .transpose(0, 2, 1, 3)
               .reshape(nb, T * TILE_B, D))

    kernel = functools.partial(lstm_classifier_kernel, seq_len=T, tile_b=TILE_B)

    # Total VMEM residency ~0.4 MiB (W_hh dominates) — fine on v5e/v6e/v7x.
    # Only if T*B*D grows toward tens of MiB should this become a grid-over-T
    # pipeline with h/c carried in scratch (threshold is halved on v7x).
    out_p = pl.pallas_call(
        kernel,
        out_shape=jax.ShapeDtypeStruct((Bp, NUM_CLASSES), jnp.float32),
        grid=(nb,),
        in_specs=[
            pl.BlockSpec((1, T * TILE_B, D), lambda i: (i, 0, 0)),      # x tile
            pl.BlockSpec((D, 4 * Hp), lambda i: (0, 0)),                # W_ih
            pl.BlockSpec((Hp, 4 * Hp), lambda i: (0, 0)),               # W_hh (bf16)
            pl.BlockSpec((1, 4 * Hp), lambda i: (0, 0)),                # bias
            pl.BlockSpec((Hp, NUM_CLASSES), lambda i: (0, 0)),          # W_out (BN folded)
            pl.BlockSpec((1, NUM_CLASSES), lambda i: (0, 0)),           # b_out (BN folded)
        ],
        out_specs=pl.BlockSpec((TILE_B, NUM_CLASSES), lambda i: (i, 0)),
        scratch_shapes=[pltpu.VMEM((T * TILE_B, 4 * Hp), jnp.float32)],  # hoisted gates_x
        compiler_params=pltpu.CompilerParams(
            # Batch tiles are independent sequences: parallel axis lets v7x's
            # second TensorCore take half the tiles once the batch grows.
            dimension_semantics=("parallel",)),
    )(x_tiles, packed["w_ih_big"], packed["w_hh_big"], packed["b_big"],
      packed["w_out_fold"], packed["b_out_fold"])

    return out_p[:B]


def reference_forward(x, params):
    """Pure-JAX reference of the PyTorch eval-mode forward (pinned f32 matmuls)."""
    B, T, D = x.shape
    H = HIDDEN
    hi = jax.lax.Precision.HIGHEST
    w_ih, w_hh = params["w_ih"], params["w_hh"]
    b = params["b_ih"] + params["b_hh"]

    def cell(carry, x_t):
        h, c = carry
        gates = (jnp.dot(x_t, w_ih.T, precision=hi)
                 + jnp.dot(h, w_hh.T, precision=hi) + b)
        i = jax.nn.sigmoid(gates[:, :H])
        f = jax.nn.sigmoid(gates[:, H:2 * H])
        g = jnp.tanh(gates[:, 2 * H:3 * H])
        o = jax.nn.sigmoid(gates[:, 3 * H:])
        c = f * c + i * g
        h = o * jnp.tanh(c)
        return (h, c), h

    init = (jnp.zeros((B, H), jnp.float32), jnp.zeros((B, H), jnp.float32))
    _, hs = jax.lax.scan(cell, init, jnp.transpose(x, (1, 0, 2)))       # (T, B, H)
    y = jnp.maximum(hs, 0.0)
    gamma = params["bn_gamma"][:, None, None]
    beta = params["bn_beta"][:, None, None]
    mean = params["bn_mean"][:, None, None]
    var = params["bn_var"][:, None, None]
    y = (y - mean) * jax.lax.rsqrt(var + BN_EPS) * gamma + beta
    logits = jnp.matmul(y, params["w_out"].T, precision=hi) + params["b_out"]
    return logits[-1]                                                   # (B, 3)


def init_params(key, T, D):
    H = HIDDEN
    ks = jax.random.split(key, 10)
    k = 1.0 / np.sqrt(H)
    return {
        "w_ih": jax.random.uniform(ks[0], (4 * H, D), jnp.float32, -k, k),
        "w_hh": jax.random.uniform(ks[1], (4 * H, H), jnp.float32, -k, k),
        "b_ih": jax.random.uniform(ks[2], (4 * H,), jnp.float32, -k, k),
        "b_hh": jax.random.uniform(ks[3], (4 * H,), jnp.float32, -k, k),
        "w_out": jax.random.uniform(ks[4], (NUM_CLASSES, H), jnp.float32, -k, k),
        "b_out": jax.random.uniform(ks[5], (NUM_CLASSES,), jnp.float32, -k, k),
        # Non-trivial BatchNorm1d(T) affine params / running stats so the
        # host-side BN -> Linear fold is actually exercised.
        "bn_gamma": jax.random.uniform(ks[6], (T,), jnp.float32, 0.5, 1.5),
        "bn_beta": jax.random.uniform(ks[7], (T,), jnp.float32, -0.5, 0.5),
        "bn_mean": jax.random.uniform(ks[8], (T,), jnp.float32, -0.5, 0.5),
        "bn_var": jax.random.uniform(ks[9], (T,), jnp.float32, 0.5, 1.5),
    }


if __name__ == "__main__":
    B, T, D = 2, 8, 16          # batch_first input (B, T, D), input_length=T
    key = jax.random.PRNGKey(0)
    pkey, xkey = jax.random.split(key)
    params = init_params(pkey, T, D)
    x = jax.random.normal(xkey, (B, T, D), jnp.float32)

    packed = prepare_params(params, T)          # host-side weight prep, once

    fwd = jax.jit(lambda xx: lstm_classifier_forward(xx, packed))
    out = jax.block_until_ready(fwd(x))

    ref = jax.block_until_ready(jax.jit(reference_forward)(x, params))
    assert out.shape == (B, NUM_CLASSES)
    # bf16 recurrent-dot operands (per perf review, v6e/v7x native MXU path)
    # introduce O(1e-3) deviation vs. the pinned-f32 reference over T steps;
    # real packing/gate-order bugs would show up at ~1e-1.
    err = float(np.max(np.abs(np.asarray(out) - np.asarray(ref))))
    assert np.allclose(np.asarray(out), np.asarray(ref), atol=1e-2, rtol=1e-2), err

    print("KERNEL_OK")
</pallas_src>

<mosaic_0001>
module attributes {stable_mosaic.version = 11 : i64} {
  func.func @lstm_classifier_kernel(%arg0: i32, %arg1: memref<1x64x16xf32, #tpu.memory_space<vmem>>, %arg2: memref<16x512xf32, #tpu.memory_space<vmem>>, %arg3: memref<128x512xbf16, #tpu.memory_space<vmem>>, %arg4: memref<1x512xf32, #tpu.memory_space<vmem>>, %arg5: memref<128x3xf32, #tpu.memory_space<vmem>>, %arg6: memref<1x3xf32, #tpu.memory_space<vmem>>, %arg7: memref<8x3xf32, #tpu.memory_space<vmem>>, %arg8: memref<64x512xf32, #tpu.memory_space<vmem>>) attributes {dimension_semantics = [#tpu.dimension_semantics<parallel>], iteration_bounds = array<i64: 1>, scalar_prefetch = 0 : i64, scratch_operands = 1 : i64, tpu.core_type = #tpu.core_type<tc>, window_params = [{transform_indices = @transform_0, window_bounds = array<i64: 1, 64, 16>}, {pipeline_mode = #tpu.pipeline_mode<synchronous>, transform_indices = @transform_1, window_bounds = array<i64: 16, 512>}, {pipeline_mode = #tpu.pipeline_mode<synchronous>, transform_indices = @transform_2, window_bounds = array<i64: 128, 512>}, {pipeline_mode = #tpu.pipeline_mode<synchronous>, transform_indices = @transform_3, window_bounds = array<i64: 1, 512>}, {pipeline_mode = #tpu.pipeline_mode<synchronous>, transform_indices = @transform_4, window_bounds = array<i64: 128, 3>}, {pipeline_mode = #tpu.pipeline_mode<synchronous>, transform_indices = @transform_5, window_bounds = array<i64: 1, 3>}, {transform_indices = @transform_6, window_bounds = array<i64: 8, 3>}]} {
    %c0 = arith.constant 0 : index
    %c0_0 = arith.constant 0 : index
    %c0_1 = arith.constant 0 : index
    %0 = vector.load %arg1[%c0, %c0_0, %c0_1] : memref<1x64x16xf32, #tpu.memory_space<vmem>>, vector<1x64x16xf32>
    %1 = vector.shape_cast %0 : vector<1x64x16xf32> to vector<64x16xf32>
    %c0_2 = arith.constant 0 : index
    %c0_3 = arith.constant 0 : index
    %2 = vector.load %arg2[%c0_2, %c0_3] : memref<16x512xf32, #tpu.memory_space<vmem>>, vector<16x512xf32>
    %cst = arith.constant dense<0.000000e+00> : vector<64x512xf32>
    %3 = tpu.matmul %1, %2, %cst {dimension_numbers = #tpu.dot_dimension_numbers<[1], [0], [0], [1], [0, 0, 1, 1], [], []>} : vector<64x16xf32>, vector<16x512xf32>, vector<64x512xf32> -> vector<64x512xf32>
    %c0_4 = arith.constant 0 : index
    %c0_5 = arith.constant 0 : index
    %4 = vector.load %arg4[%c0_4, %c0_5] : memref<1x512xf32, #tpu.memory_space<vmem>>, vector<1x512xf32>
    %5 = vector.broadcast %4 : vector<1x512xf32> to vector<64x512xf32>
    %6 = arith.addf %3, %5 : vector<64x512xf32>
    %c0_6 = arith.constant 0 : index
    %c0_7 = arith.constant 0 : index
    %7 = vector.load %arg8[%c0_6, %c0_7] : memref<64x512xf32, #tpu.memory_space<vmem>>, vector<64x512xf32>
    tpu.vector_store %arg8[%c0_6, %c0_7], %6 {strides = array<i32>} : memref<64x512xf32, #tpu.memory_space<vmem>>, vector<64x512xf32>,
    %cst_8 = arith.constant 0.000000e+00 : f32
    %8 = vector.broadcast %cst_8 : f32 to vector<8x128xf32>
    %cst_9 = arith.constant 0.000000e+00 : f32
    %9 = vector.broadcast %cst_9 : f32 to vector<8x128xf32>
    %10 = arith.truncf %8 : vector<8x128xf32> to vector<8x128xbf16>
    %c0_10 = arith.constant 0 : index
    %c0_11 = arith.constant 0 : index
    %11 = vector.load %arg3[%c0_10, %c0_11] : memref<128x512xbf16, #tpu.memory_space<vmem>>, vector<128x512xbf16>
    %cst_12 = arith.constant dense<0.000000e+00> : vector<8x512xf32>
    %12 = tpu.matmul %10, %11, %cst_12 {dimension_numbers = #tpu.dot_dimension_numbers<[1], [0], [0], [1], [0, 0, 1, 1], [], []>} : vector<8x128xbf16>, vector<128x512xbf16>, vector<8x512xf32> -> vector<8x512xf32>
    %c0_13 = arith.constant 0 : index
    %c0_14 = arith.constant 0 : index
    %13 = vector.load %arg8[%c0_13, %c0_14] : memref<64x512xf32, #tpu.memory_space<vmem>>, vector<8x512xf32>
    %14 = arith.addf %13, %12 : vector<8x512xf32>
    %15 = vector.extract_strided_slice %14 {offsets = [0, 0], sizes = [8, 384], strides = [1, 1]} : vector<8x512xf32> to vector<8x384xf32>
    %16 = arith.negf %15 : vector<8x384xf32>
    %17 = math.exp %16 : vector<8x384xf32>
    %cst_15 = arith.constant 1.000000e+00 : f32
    %18 = vector.broadcast %cst_15 : f32 to vector<8x384xf32>
    %19 = arith.addf %18, %17 : vector<8x384xf32>
    %20 = arith.divf %18, %19 : vector<8x384xf32>
    %21 = vector.extract_strided_slice %14 {offsets = [0, 384], sizes = [8, 128], strides = [1, 1]} : vector<8x512xf32> to vector<8x128xf32>
    %22 = math.tanh %21 : vector<8x128xf32>
    %23 = vector.extract_strided_slice %20 {offsets = [0, 0], sizes = [8, 128], strides = [1, 1]} : vector<8x384xf32> to vector<8x128xf32>
    %24 = vector.extract_strided_slice %20 {offsets = [0, 128], sizes = [8, 128], strides = [1, 1]} : vector<8x384xf32> to vector<8x128xf32>
    %25 = vector.extract_strided_slice %20 {offsets = [0, 256], sizes = [8, 128], strides = [1, 1]} : vector<8x384xf32> to vector<8x128xf32>
    %26 = arith.mulf %24, %9 : vector<8x128xf32>
    %27 = arith.mulf %23, %22 : vector<8x128xf32>
    %28 = arith.addf %26, %27 : vector<8x128xf32>
    %29 = math.tanh %28 : vector<8x128xf32>
    %30 = arith.mulf %25, %29 : vector<8x128xf32>
    %31 = arith.truncf %30 : vector<8x128xf32> to vector<8x128xbf16>
    %c0_16 = arith.constant 0 : index
    %c0_17 = arith.constant 0 : index
    %32 = vector.load %arg3[%c0_16, %c0_17] : memref<128x512xbf16, #tpu.memory_space<vmem>>, vector<128x512xbf16>
    %cst_18 = arith.constant dense<0.000000e+00> : vector<8x512xf32>
    %33 = tpu.matmul %31, %32, %cst_18 {dimension_numbers = #tpu.dot_dimension_numbers<[1], [0], [0], [1], [0, 0, 1, 1], [], []>} : vector<8x128xbf16>, vector<128x512xbf16>, vector<8x512xf32> -> vector<8x512xf32>
    %c8 = arith.constant 8 : index
    %c0_19 = arith.constant 0 : index
    %34 = vector.load %arg8[%c8, %c0_19] : memref<64x512xf32, #tpu.memory_space<vmem>>, vector<8x512xf32>
    %35 = arith.addf %34, %33 : vector<8x512xf32>
    %36 = vector.extract_strided_slice %35 {offsets = [0, 0], sizes = [8, 384], strides = [1, 1]} : vector<8x512xf32> to vector<8x384xf32>
    %37 = arith.negf %36 : vector<8x384xf32>
    %38 = math.exp %37 : vector<8x384xf32>
    %cst_20 = arith.constant 1.000000e+00 : f32
    %39 = vector.broadcast %cst_20 : f32 to vector<8x384xf32>
    %40 = arith.addf %39, %38 : vector<8x384xf32>
    %41 = arith.divf %39, %40 : vector<8x384xf32>
    %42 = vector.extract_strided_slice %35 {offsets = [0, 384], sizes = [8, 128], strides = [1, 1]} : vector<8x512xf32> to vector<8x128xf32>
    %43 = math.tanh %42 : vector<8x128xf32>
    %44 = vector.extract_strided_slice %41 {offsets = [0, 0], sizes = [8, 128], strides = [1, 1]} : vector<8x384xf32> to vector<8x128xf32>
    %45 = vector.extract_strided_slice %41 {offsets = [0, 128], sizes = [8, 128], strides = [1, 1]} : vector<8x384xf32> to vector<8x128xf32>
    %46 = vector.extract_strided_slice %41 {offsets = [0, 256], sizes = [8, 128], strides = [1, 1]} : vector<8x384xf32> to vector<8x128xf32>
    %47 = arith.mulf %45, %28 : vector<8x128xf32>
    %48 = arith.mulf %44, %43 : vector<8x128xf32>
    %49 = arith.addf %47, %48 : vector<8x128xf32>
    %50 = math.tanh %49 : vector<8x128xf32>
    %51 = arith.mulf %46, %50 : vector<8x128xf32>
    %52 = arith.truncf %51 : vector<8x128xf32> to vector<8x128xbf16>
    %c0_21 = arith.constant 0 : index
    %c0_22 = arith.constant 0 : index
    %53 = vector.load %arg3[%c0_21, %c0_22] : memref<128x512xbf16, #tpu.memory_space<vmem>>, vector<128x512xbf16>
    %cst_23 = arith.constant dense<0.000000e+00> : vector<8x512xf32>
    %54 = tpu.matmul %52, %53, %cst_23 {dimension_numbers = #tpu.dot_dimension_numbers<[1], [0], [0], [1], [0, 0, 1, 1], [], []>} : vector<8x128xbf16>, vector<128x512xbf16>, vector<8x512xf32> -> vector<8x512xf32>
    %c16 = arith.constant 16 : index
    %c0_24 = arith.constant 0 : index
    %55 = vector.load %arg8[%c16, %c0_24] : memref<64x512xf32, #tpu.memory_space<vmem>>, vector<8x512xf32>
    %56 = arith.addf %55, %54 : vector<8x512xf32>
    %57 = vector.extract_strided_slice %56 {offsets = [0, 0], sizes = [8, 384], strides = [1, 1]} : vector<8x512xf32> to vector<8x384xf32>
    %58 = arith.negf %57 : vector<8x384xf32>
    %59 = math.exp %58 : vector<8x384xf32>
    %cst_25 = arith.constant 1.000000e+00 : f32
    %60 = vector.broadcast %cst_25 : f32 to vector<8x384xf32>
    %61 = arith.addf %60, %59 : vector<8x384xf32>
    %62 = arith.divf %60, %61 : vector<8x384xf32>
    %63 = vector.extract_strided_slice %56 {offsets = [0, 384], sizes = [8, 128], strides = [1, 1]} : vector<8x512xf32> to vector<8x128xf32>
    %64 = math.tanh %63 : vector<8x128xf32>
    %65 = vector.extract_strided_slice %62 {offsets = [0, 0], sizes = [8, 128], strides = [1, 1]} : vector<8x384xf32> to vector<8x128xf32>
    %66 = vector.extract_strided_slice %62 {offsets = [0, 128], sizes = [8, 128], strides = [1, 1]} : vector<8x384xf32> to vector<8x128xf32>
    %67 = vector.extract_strided_slice %62 {offsets = [0, 256], sizes = [8, 128], strides = [1, 1]} : vector<8x384xf32> to vector<8x128xf32>
    %68 = arith.mulf %66, %49 : vector<8x128xf32>
    %69 = arith.mulf %65, %64 : vector<8x128xf32>
    %70 = arith.addf %68, %69 : vector<8x128xf32>
    %71 = math.tanh %70 : vector<8x128xf32>
    %72 = arith.mulf %67, %71 : vector<8x128xf32>
    %73 = arith.truncf %72 : vector<8x128xf32> to vector<8x128xbf16>
    %c0_26 = arith.constant 0 : index
    %c0_27 = arith.constant 0 : index
    %74 = vector.load %arg3[%c0_26, %c0_27] : memref<128x512xbf16, #tpu.memory_space<vmem>>, vector<128x512xbf16>
    %cst_28 = arith.constant dense<0.000000e+00> : vector<8x512xf32>
    %75 = tpu.matmul %73, %74, %cst_28 {dimension_numbers = #tpu.dot_dimension_numbers<[1], [0], [0], [1], [0, 0, 1, 1], [], []>} : vector<8x128xbf16>, vector<128x512xbf16>, vector<8x512xf32> -> vector<8x512xf32>
    %c24 = arith.constant 24 : index
    %c0_29 = arith.constant 0 : index
    %76 = vector.load %arg8[%c24, %c0_29] : memref<64x512xf32, #tpu.memory_space<vmem>>, vector<8x512xf32>
    %77 = arith.addf %76, %75 : vector<8x512xf32>
    %78 = vector.extract_strided_slice %77 {offsets = [0, 0], sizes = [8, 384], strides = [1, 1]} : vector<8x512xf32> to vector<8x384xf32>
    %79 = arith.negf %78 : vector<8x384xf32>
    %80 = math.exp %79 : vector<8x384xf32>
    %cst_30 = arith.constant 1.000000e+00 : f32
    %81 = vector.broadcast %cst_30 : f32 to vector<8x384xf32>
    %82 = arith.addf %81, %80 : vector<8x384xf32>
    %83 = arith.divf %81, %82 : vector<8x384xf32>
    %84 = vector.extract_strided_slice %77 {offsets = [0, 384], sizes = [8, 128], strides = [1, 1]} : vector<8x512xf32> to vector<8x128xf32>
    %85 = math.tanh %84 : vector<8x128xf32>
    %86 = vector.extract_strided_slice %83 {offsets = [0, 0], sizes = [8, 128], strides = [1, 1]} : vector<8x384xf32> to vector<8x128xf32>
    %87 = vector.extract_strided_slice %83 {offsets = [0, 128], sizes = [8, 128], strides = [1, 1]} : vector<8x384xf32> to vector<8x128xf32>
    %88 = vector.extract_strided_slice %83 {offsets = [0, 256], sizes = [8, 128], strides = [1, 1]} : vector<8x384xf32> to vector<8x128xf32>
    %89 = arith.mulf %87, %70 : vector<8x128xf32>
    %90 = arith.mulf %86, %85 : vector<8x128xf32>
    %91 = arith.addf %89, %90 : vector<8x128xf32>
    %92 = math.tanh %91 : vector<8x128xf32>
    %93 = arith.mulf %88, %92 : vector<8x128xf32>
    %94 = arith.truncf %93 : vector<8x128xf32> to vector<8x128xbf16>
    %c0_31 = arith.constant 0 : index
    %c0_32 = arith.constant 0 : index
    %95 = vector.load %arg3[%c0_31, %c0_32] : memref<128x512xbf16, #tpu.memory_space<vmem>>, vector<128x512xbf16>
    %cst_33 = arith.constant dense<0.000000e+00> : vector<8x512xf32>
    %96 = tpu.matmul %94, %95, %cst_33 {dimension_numbers = #tpu.dot_dimension_numbers<[1], [0], [0], [1], [0, 0, 1, 1], [], []>} : vector<8x128xbf16>, vector<128x512xbf16>, vector<8x512xf32> -> vector<8x512xf32>
    %c32 = arith.constant 32 : index
    %c0_34 = arith.constant 0 : index
    %97 = vector.load %arg8[%c32, %c0_34] : memref<64x512xf32, #tpu.memory_space<vmem>>, vector<8x512xf32>
    %98 = arith.addf %97, %96 : vector<8x512xf32>
    %99 = vector.extract_strided_slice %98 {offsets = [0, 0], sizes = [8, 384], strides = [1, 1]} : vector<8x512xf32> to vector<8x384xf32>
    %100 = arith.negf %99 : vector<8x384xf32>
    %101 = math.exp %100 : vector<8x384xf32>
    %cst_35 = arith.constant 1.000000e+00 : f32
    %102 = vector.broadcast %cst_35 : f32 to vector<8x384xf32>
    %103 = arith.addf %102, %101 : vector<8x384xf32>
    %104 = arith.divf %102, %103 : vector<8x384xf32>
    %105 = vector.extract_strided_slice %98 {offsets = [0, 384], sizes = [8, 128], strides = [1, 1]} : vector<8x512xf32> to vector<8x128xf32>
    %106 = math.tanh %105 : vector<8x128xf32>
    %107 = vector.extract_strided_slice %104 {offsets = [0, 0], sizes = [8, 128], strides = [1, 1]} : vector<8x384xf32> to vector<8x128xf32>
    %108 = vector.extract_strided_slice %104 {offsets = [0, 128], sizes = [8, 128], strides = [1, 1]} : vector<8x384xf32> to vector<8x128xf32>
    %109 = vector.extract_strided_slice %104 {offsets = [0, 256], sizes = [8, 128], strides = [1, 1]} : vector<8x384xf32> to vector<8x128xf32>
    %110 = arith.mulf %108, %91 : vector<8x128xf32>
    %111 = arith.mulf %107, %106 : vector<8x128xf32>
    %112 = arith.addf %110, %111 : vector<8x128xf32>
    %113 = math.tanh %112 : vector<8x128xf32>
    %114 = arith.mulf %109, %113 : vector<8x128xf32>
    %115 = arith.truncf %114 : vector<8x128xf32> to vector<8x128xbf16>
    %c0_36 = arith.constant 0 : index
    %c0_37 = arith.constant 0 : index
    %116 = vector.load %arg3[%c0_36, %c0_37] : memref<128x512xbf16, #tpu.memory_space<vmem>>, vector<128x512xbf16>
    %cst_38 = arith.constant dense<0.000000e+00> : vector<8x512xf32>
    %117 = tpu.matmul %115, %116, %cst_38 {dimension_numbers = #tpu.dot_dimension_numbers<[1], [0], [0], [1], [0, 0, 1, 1], [], []>} : vector<8x128xbf16>, vector<128x512xbf16>, vector<8x512xf32> -> vector<8x512xf32>
    %c40 = arith.constant 40 : index
    %c0_39 = arith.constant 0 : index
    %118 = vector.load %arg8[%c40, %c0_39] : memref<64x512xf32, #tpu.memory_space<vmem>>, vector<8x512xf32>
    %119 = arith.addf %118, %117 : vector<8x512xf32>
    %120 = vector.extract_strided_slice %119 {offsets = [0, 0], sizes = [8, 384], strides = [1, 1]} : vector<8x512xf32> to vector<8x384xf32>
    %121 = arith.negf %120 : vector<8x384xf32>
    %122 = math.exp %121 : vector<8x384xf32>
    %cst_40 = arith.constant 1.000000e+00 : f32
    %123 = vector.broadcast %cst_40 : f32 to vector<8x384xf32>
    %124 = arith.addf %123, %122 : vector<8x384xf32>
    %125 = arith.divf %123, %124 : vector<8x384xf32>
    %126 = vector.extract_strided_slice %119 {offsets = [0, 384], sizes = [8, 128], strides = [1, 1]} : vector<8x512xf32> to vector<8x128xf32>
    %127 = math.tanh %126 : vector<8x128xf32>
    %128 = vector.extract_strided_slice %125 {offsets = [0, 0], sizes = [8, 128], strides = [1, 1]} : vector<8x384xf32> to vector<8x128xf32>
    %129 = vector.extract_strided_slice %125 {offsets = [0, 128], sizes = [8, 128], strides = [1, 1]} : vector<8x384xf32> to vector<8x128xf32>
    %130 = vector.extract_strided_slice %125 {offsets = [0, 256], sizes = [8, 128], strides = [1, 1]} : vector<8x384xf32> to vector<8x128xf32>
    %131 = arith.mulf %129, %112 : vector<8x128xf32>
    %132 = arith.mulf %128, %127 : vector<8x128xf32>
    %133 = arith.addf %131, %132 : vector<8x128xf32>
    %134 = math.tanh %133 : vector<8x128xf32>
    %135 = arith.mulf %130, %134 : vector<8x128xf32>
    %136 = arith.truncf %135 : vector<8x128xf32> to vector<8x128xbf16>
    %c0_41 = arith.constant 0 : index
    %c0_42 = arith.constant 0 : index
    %137 = vector.load %arg3[%c0_41, %c0_42] : memref<128x512xbf16, #tpu.memory_space<vmem>>, vector<128x512xbf16>
    %cst_43 = arith.constant dense<0.000000e+00> : vector<8x512xf32>
    %138 = tpu.matmul %136, %137, %cst_43 {dimension_numbers = #tpu.dot_dimension_numbers<[1], [0], [0], [1], [0, 0, 1, 1], [], []>} : vector<8x128xbf16>, vector<128x512xbf16>, vector<8x512xf32> -> vector<8x512xf32>
    %c48 = arith.constant 48 : index
    %c0_44 = arith.constant 0 : index
    %139 = vector.load %arg8[%c48, %c0_44] : memref<64x512xf32, #tpu.memory_space<vmem>>, vector<8x512xf32>
    %140 = arith.addf %139, %138 : vector<8x512xf32>
    %141 = vector.extract_strided_slice %140 {offsets = [0, 0], sizes = [8, 384], strides = [1, 1]} : vector<8x512xf32> to vector<8x384xf32>
    %142 = arith.negf %141 : vector<8x384xf32>
    %143 = math.exp %142 : vector<8x384xf32>
    %cst_45 = arith.constant 1.000000e+00 : f32
    %144 = vector.broadcast %cst_45 : f32 to vector<8x384xf32>
    %145 = arith.addf %144, %143 : vector<8x384xf32>
    %146 = arith.divf %144, %145 : vector<8x384xf32>
    %147 = vector.extract_strided_slice %140 {offsets = [0, 384], sizes = [8, 128], strides = [1, 1]} : vector<8x512xf32> to vector<8x128xf32>
    %148 = math.tanh %147 : vector<8x128xf32>
    %149 = vector.extract_strided_slice %146 {offsets = [0, 0], sizes = [8, 128], strides = [1, 1]} : vector<8x384xf32> to vector<8x128xf32>
    %150 = vector.extract_strided_slice %146 {offsets = [0, 128], sizes = [8, 128], strides = [1, 1]} : vector<8x384xf32> to vector<8x128xf32>
    %151 = vector.extract_strided_slice %146 {offsets = [0, 256], sizes = [8, 128], strides = [1, 1]} : vector<8x384xf32> to vector<8x128xf32>
    %152 = arith.mulf %150, %133 : vector<8x128xf32>
    %153 = arith.mulf %149, %148 : vector<8x128xf32>
    %154 = arith.addf %152, %153 : vector<8x128xf32>
    %155 = math.tanh %154 : vector<8x128xf32>
    %156 = arith.mulf %151, %155 : vector<8x128xf32>
    %157 = arith.truncf %156 : vector<8x128xf32> to vector<8x128xbf16>
    %c0_46 = arith.constant 0 : index
    %c0_47 = arith.constant 0 : index
    %158 = vector.load %arg3[%c0_46, %c0_47] : memref<128x512xbf16, #tpu.memory_space<vmem>>, vector<128x512xbf16>
    %cst_48 = arith.constant dense<0.000000e+00> : vector<8x512xf32>
    %159 = tpu.matmul %157, %158, %cst_48 {dimension_numbers = #tpu.dot_dimension_numbers<[1], [0], [0], [1], [0, 0, 1, 1], [], []>} : vector<8x128xbf16>, vector<128x512xbf16>, vector<8x512xf32> -> vector<8x512xf32>
    %c56 = arith.constant 56 : index
    %c0_49 = arith.constant 0 : index
    %160 = vector.load %arg8[%c56, %c0_49] : memref<64x512xf32, #tpu.memory_space<vmem>>, vector<8x512xf32>
    %161 = arith.addf %160, %159 : vector<8x512xf32>
    %162 = vector.extract_strided_slice %161 {offsets = [0, 0], sizes = [8, 384], strides = [1, 1]} : vector<8x512xf32> to vector<8x384xf32>
    %163 = arith.negf %162 : vector<8x384xf32>
    %164 = math.exp %163 : vector<8x384xf32>
    %cst_50 = arith.constant 1.000000e+00 : f32
    %165 = vector.broadcast %cst_50 : f32 to vector<8x384xf32>
    %166 = arith.addf %165, %164 : vector<8x384xf32>
    %167 = arith.divf %165, %166 : vector<8x384xf32>
    %168 = vector.extract_strided_slice %161 {offsets = [0, 384], sizes = [8, 128], strides = [1, 1]} : vector<8x512xf32> to vector<8x128xf32>
    %169 = math.tanh %168 : vector<8x128xf32>
    %170 = vector.extract_strided_slice %167 {offsets = [0, 0], sizes = [8, 128], strides = [1, 1]} : vector<8x384xf32> to vector<8x128xf32>
    %171 = vector.extract_strided_slice %167 {offsets = [0, 128], sizes = [8, 128], strides = [1, 1]} : vector<8x384xf32> to vector<8x128xf32>
    %172 = vector.extract_strided_slice %167 {offsets = [0, 256], sizes = [8, 128], strides = [1, 1]} : vector<8x384xf32> to vector<8x128xf32>
    %173 = arith.mulf %171, %154 : vector<8x128xf32>
    %174 = arith.mulf %170, %169 : vector<8x128xf32>
    %175 = arith.addf %173, %174 : vector<8x128xf32>
    %176 = math.tanh %175 : vector<8x128xf32>
    %177 = arith.mulf %172, %176 : vector<8x128xf32>
    %cst_51 = arith.constant 0.000000e+00 : f32
    %178 = vector.broadcast %cst_51 : f32 to vector<8x128xf32>
    %179 = arith.maximumf %177, %178 : vector<8x128xf32>
    %c0_52 = arith.constant 0 : index
    %c0_53 = arith.constant 0 : index
    %180 = vector.load %arg5[%c0_52, %c0_53] : memref<128x3xf32, #tpu.memory_space<vmem>>, vector<128x3xf32>
    %cst_54 = arith.constant dense<0.000000e+00> : vector<8x3xf32>
    %181 = tpu.matmul %179, %180, %cst_54 {dimension_numbers = #tpu.dot_dimension_numbers<[1], [0], [0], [1], [0, 0, 1, 1], [], []>} : vector<8x128xf32>, vector<128x3xf32>, vector<8x3xf32> -> vector<8x3xf32>
    %c0_55 = arith.constant 0 : index
    %c0_56 = arith.constant 0 : index
    %182 = vector.load %arg6[%c0_55, %c0_56] : memref<1x3xf32, #tpu.memory_space<vmem>>, vector<1x3xf32>
    %183 = vector.broadcast %182 : vector<1x3xf32> to vector<8x3xf32>
    %184 = arith.addf %181, %183 : vector<8x3xf32>
    %c0_57 = arith.constant 0 : index
    %c0_58 = arith.constant 0 : index
    %185 = vector.load %arg7[%c0_57, %c0_58] : memref<8x3xf32, #tpu.memory_space<vmem>>, vector<8x3xf32>
    tpu.vector_store %arg7[%c0_57, %c0_58], %184 {strides = array<i32>} : memref<8x3xf32, #tpu.memory_space<vmem>>, vector<8x3xf32>,
    return
  }
  func.func @transform_0(%arg0: i32) -> (i32, i32, i32) {
    %c0_i32 = arith.constant 0 : i32
    %c0_i32_0 = arith.constant 0 : i32
    %c0_i32_1 = arith.constant 0 : i32
    return %arg0, %c0_i32, %c0_i32_0 : i32, i32, i32
  }
  func.func @transform_1(%arg0: i32) -> (i32, i32) {
    %c0_i32 = arith.constant 0 : i32
    %c0_i32_0 = arith.constant 0 : i32
    %c0_i32_1 = arith.constant 0 : i32
    return %c0_i32, %c0_i32_0 : i32, i32
  }
  func.func @transform_2(%arg0: i32) -> (i32, i32) {
    %c0_i32 = arith.constant 0 : i32
    %c0_i32_0 = arith.constant 0 : i32
    %c0_i32_1 = arith.constant 0 : i32
    return %c0_i32, %c0_i32_0 : i32, i32
  }
  func.func @transform_3(%arg0: i32) -> (i32, i32) {
    %c0_i32 = arith.constant 0 : i32
    %c0_i32_0 = arith.constant 0 : i32
    %c0_i32_1 = arith.constant 0 : i32
    return %c0_i32, %c0_i32_0 : i32, i32
  }
  func.func @transform_4(%arg0: i32) -> (i32, i32) {
    %c0_i32 = arith.constant 0 : i32
    %c0_i32_0 = arith.constant 0 : i32
    %c0_i32_1 = arith.constant 0 : i32
    return %c0_i32, %c0_i32_0 : i32, i32
  }
  func.func @transform_5(%arg0: i32) -> (i32, i32) {
    %c0_i32 = arith.constant 0 : i32
    %c0_i32_0 = arith.constant 0 : i32
    %c0_i32_1 = arith.constant 0 : i32
    return %c0_i32, %c0_i32_0 : i32, i32
  }
  func.func @transform_6(%arg0: i32) -> (i32, i32) {
    %c0_i32 = arith.constant 0 : i32
    %c0_i32_0 = arith.constant 0 : i32
    return %arg0, %c0_i32 : i32, i32
  }
}

</mosaic_0001>

<bundles_post_ra>
// kernel: _lambda_.1
= control target key start
LH: loop header
LB: loop body
LE: loop exit
PB: predicated region body
PF: predicated region fallthrough
CT: control target
= control target key end

     0   :  { %11 = vsyncpa [#allocation4], 0  ;;  %s1932_s21 = smov [#allocation3]   ;;  %s2652_s0 = inlined_call_operand.vmem [shape: f32[1,64,16], index: 0, kind: input, shape index: {}]   ;;  %s2653_s1 = inlined_call_operand.vmem [shape: f32[16,512], index: 1, kind: input, shape index: {}]   ;;  %s2654_s2 = inlined_call_operand.hbm [shape: bf16[128,512], index: 2, kind: input, shape index: {}]   ;;  %s2655_s3 = inlined_call_operand.vmem [shape: f32[1,512], index: 3, kind: input, shape index: {}]   ;;  %s2656_s4 = inlined_call_operand.vmem [shape: f32[128,3], index: 4, kind: input, shape index: {}]   ;;  %s2657_s5 = inlined_call_operand.vmem [shape: f32[1,3], index: 5, kind: input, shape index: {}]   ;;  %s2658_s6 = inlined_call_operand.vmem [shape: f32[8,3], index: 6, kind: output, shape index: {}]  }
   0x1   :  { %s21_s22 = sshll.u32 %s1932_s21, 4  ;;  %s22_s22 = int_to_ptr.vmem [resolvable:$true] %s21_s22 }
   0x2   :  { %s1918_s23 = scalar_lea.vmem %s22_s22, 4096  ;;  %p1923_p1 = scmp.lt.s32.totalorder %s22_s22, %s22_s22 }
   0x3   :  { %p1919_p0 = scmp.ne.s32.totalorder %s22_s22, %s1918_s23  ;;  %p1924_p2 = scmp.lt.s32.totalorder %s1918_s23, %s1918_s23 }
   0x5   :  { %p1925_p3 = por %p1924_p2, %p1923_p1 }
   0x7   :  { %p1926_p4 = pnand %p1925_p3, %p1919_p0 }
   0x9   :  { %1929 = shalt.err (!%p1926_p4)
}
   0xa   :  { %s1933_s24 = smov 256   ;;  %s1934_s25 = smov 16  }
   0xb   :  { %27 = dma.hbm_to_vmem [thread:$0]  %s2654_s2, 4096, %s22_s22, [#allocation4], %s1933_s24, %s1933_s24, %s1934_s25  }
   0xc   :  { %1930 = dma.done.wait [#allocation4], 4096  }
   0xd   :  { %1931 = vsyncadd [#allocation4], 4294963200  ;;  %v2659_v0 = vmov 0.0   ;;  %v51_v1 = vld [vmem:[%s2653_s1 + $0x28] sm:$0xff]  ;;  %v53_v2 = vld [vmem:[%s2653_s1 + $0x38] sm:$0xff]  ;;  %vm76_vm0 = vcmask 130048   ;;  %v56_v50 = vlaneseq }
   0xe   :  { %165 = vmatprep.mubr.f32.mxu0 %v2659_v0  ;;  %278 = vmatprep.mubr.f32.mxu1 %v2659_v0  ;;  %v50_v3 = vld [vmem:[%s2653_s1 + $0x20] sm:$0xff]  ;;  %v52_v4 = vld [vmem:[%s2653_s1 + $0x30] sm:$0xff]  ;;  %v47_v5 = vld [vmem:[%s2653_s1 + $0x8] sm:$0xff]  ;;  %v2661_v49 = vmov 0   ;;  %vm1937_vm1 = vmmov 0   ;;  %vm1564_vm2 = vcmask 23552  }
   0xf   :  { %129 = vmatprep.subr.mxu0 %v51_v1  ;;  %242 = vmatprep.subr.mxu1 %v53_v2  ;;  %v49_v6 = vld [vmem:[%s2653_s1 + $0x18] sm:$0xff]  ;;  %v46_v7 = vld [vmem:[%s2653_s1] sm:$0xff]  ;;  %v48_v8 = vld [vmem:[%s2653_s1 + $0x10] sm:$0xff]  ;;  %v57_v51 = vshrl.u32 %v56_v50, 7 }
  0x10   :  { %130 = vmatpush1.msra.mxu0 %v50_v3  ;;  %243 = vmatpush1.msra.mxu1 %v52_v4  ;;  %v38_v9 = vld [vmem:[%s2652_s0] sm:$0xff]  ;;  %v2007_v11 = vld [vmem:[#allocation3 + $0xec] ss:$16 sps:$4 sm:$0xff]   ;;  %v2013_v13 = vld [vmem:[#allocation3 + $0xe8] ss:$16 sps:$4 sm:$0xff]  }
  0x11   :  { %131 = vmatprep.subr.mxu0 %v47_v5  ;;  %244 = vmatprep.subr.mxu1 %v49_v6  ;;  %v2005_v10 = vld [vmem:[#allocation3 + $0xe4] ss:$16 sps:$4 sm:$0xff]   ;;  %v2011_v12 = vld [vmem:[#allocation3 + $0xe0] ss:$16 sps:$4 sm:$0xff]   ;;  %v39_v14 = vld [vmem:[%s2652_s0 + $0x8] sm:$0xff]  ;;  %v58_v52 = vsub.s32 0, %v57_v51 }
  0x12   :  { %132 = vmatpush1.msra.mxu0 %v46_v7  ;;  %245 = vmatpush1.msra.mxu1 %v48_v8  ;;  %v2020_v15 = vld [vmem:[#allocation3 + $0xc4] ss:$16 sps:$4 sm:$0xff]   ;;  %v2024_v16 = vld [vmem:[#allocation3 + $0xcc] ss:$16 sps:$4 sm:$0xff]   ;;  %v2028_v17 = vld [vmem:[#allocation3 + $0xc0] ss:$16 sps:$4 sm:$0xff]  }
  0x13   :  { %1571 = vmatmul.mubr.msk.f32.vlgmr.msra.gmra.mxu0 %vm76_vm0, %v38_v9  ;;  %1579 = vmatmul.mubr.msk.f32.vlgmr.msra.gmra.mxu1 %vm76_vm0, %v38_v9  ;;  %v2030_v18 = vld [vmem:[#allocation3 + $0xc8] ss:$16 sps:$4 sm:$0xff]   ;;  %v40_v19 = vld [vmem:[%s2652_s0 + $0x10] sm:$0xff]  ;;  %v2041_v21 = vld [vmem:[#allocation3 + $0xac] ss:$16 sps:$4 sm:$0xff]   ;;  %v66_v53 = vsub.s32 2, %v57_v51 }
  0x14   :  { %551 = vmatprep.subr.bf16.mxu0 %v2005_v10  ;;  %592 = vmatprep.subr.bf16.mxu1 %v2007_v11  ;;  %v2037_v20 = vld [vmem:[#allocation3 + $0xa4] ss:$16 sps:$4 sm:$0xff]   ;;  %v2045_v22 = vld [vmem:[#allocation3 + $0xa0] ss:$16 sps:$4 sm:$0xff]   ;;  %v2047_v23 = vld [vmem:[#allocation3 + $0xa8] ss:$16 sps:$4 sm:$0xff]  }
  0x15   :  { %552 = vmatpush1.bf16.msra.mxu0 %v2011_v12  ;;  %593 = vmatpush1.bf16.msra.mxu1 %v2013_v13  ;;  %v41_v24 = vld [vmem:[%s2652_s0 + $0x18] sm:$0xff]  ;;  %v2058_v25 = vld [vmem:[#allocation3 + $0x84] ss:$16 sps:$4 sm:$0xff]   ;;  %v2062_v27 = vld [vmem:[#allocation3 + $0x80] ss:$16 sps:$4 sm:$0xff]   ;;  %v62_v57 = vsub.s32 1, %v57_v51 }
  0x16   :  { %171 = vmatprep.mubr.f32.mxu0 %v2659_v0  ;;  %284 = vmatprep.mubr.f32.mxu1 %v2659_v0  ;;  %v2060_v26 = vld [vmem:[#allocation3 + $0x8c] ss:$16 sps:$4 sm:$0xff]   ;;  %v2066_v28 = vld [vmem:[#allocation3 + $0x88] ss:$16 sps:$4 sm:$0xff]   ;;  %v42_v29 = vld [vmem:[%s2652_s0 + $0x20] sm:$0xff]  ;;  %v70_v58 = vsub.s32 3, %v57_v51 }
  0x17   :  { %1572 = vmatmul.mubr.msk.f32.gmra.mxu0 %vm76_vm0, %v39_v14  ;;  %1580 = vmatmul.mubr.msk.f32.gmra.mxu1 %vm76_vm0, %v39_v14  ;;  %v2075_v30 = vld [vmem:[#allocation3 + $0x64] ss:$16 sps:$4 sm:$0xff]   ;;  %v2077_v31 = vld [vmem:[#allocation3 + $0x6c] ss:$16 sps:$4 sm:$0xff]   ;;  %v2081_v32 = vld [vmem:[#allocation3 + $0x60] ss:$16 sps:$4 sm:$0xff]  }
  0x18   :  { %553 = vmatprep.subr.bf16.mxu0 %v2020_v15  ;;  %594 = vmatprep.subr.bf16.mxu1 %v2024_v16  ;;  %v2085_v33 = vld [vmem:[#allocation3 + $0x68] ss:$16 sps:$4 sm:$0xff]   ;;  %v2094_v35 = vld [vmem:[#allocation3 + $0x44] ss:$16 sps:$4 sm:$0xff]   ;;  %v2098_v36 = vld [vmem:[#allocation3 + $0x4c] ss:$16 sps:$4 sm:$0xff]  }
  0x19   :  { %554 = vmatpush1.bf16.msra.mxu0 %v2028_v17  ;;  %595 = vmatpush1.bf16.msra.mxu1 %v2030_v18  ;;  %v43_v34 = vld [vmem:[%s2652_s0 + $0x28] sm:$0xff]  ;;  %v2102_v37 = vld [vmem:[#allocation3 + $0x40] ss:$16 sps:$4 sm:$0xff]   ;;  %v2115_v40 = vld [vmem:[#allocation3 + $0x24] ss:$16 sps:$4 sm:$0xff]  }
  0x1a   :  { %177 = vmatprep.mubr.f32.mxu0 %v2659_v0  ;;  %290 = vmatprep.mubr.f32.mxu1 %v2659_v0  ;;  %v2104_v38 = vld [vmem:[#allocation3 + $0x48] ss:$16 sps:$4 sm:$0xff]   ;;  %v44_v39 = vld [vmem:[%s2652_s0 + $0x30] sm:$0xff]  ;;  %v2117_v41 = vld [vmem:[#allocation3 + $0x2c] ss:$16 sps:$4 sm:$0xff]  }
  0x1b   :  { %1573 = vmatmul.mubr.msk.f32.gmra.mxu0 %vm76_vm0, %v40_v19  ;;  %1581 = vmatmul.mubr.msk.f32.gmra.mxu1 %vm76_vm0, %v40_v19  ;;  %v2121_v42 = vld [vmem:[#allocation3 + $0x20] ss:$16 sps:$4 sm:$0xff]   ;;  %v2123_v43 = vld [vmem:[#allocation3 + $0x28] ss:$16 sps:$4 sm:$0xff]   ;;  %v2134_v45 = vld [vmem:[#allocation3 + $0x4] ss:$16 sps:$4 sm:$0xff]  }
  0x1c   :  { %555 = vmatprep.subr.bf16.mxu0 %v2037_v20  ;;  %596 = vmatprep.subr.bf16.mxu1 %v2041_v21  ;;  %v45_v44 = vld [vmem:[%s2652_s0 + $0x38] sm:$0xff]  ;;  %v2140_v47 = vld [vmem:[#allocation3] ss:$16 sps:$4 sm:$0xff]  }
  0x1d   :  { %556 = vmatpush1.bf16.msra.mxu0 %v2045_v22  ;;  %597 = vmatpush1.bf16.msra.mxu1 %v2047_v23  ;;  %v2136_v46 = vld [vmem:[#allocation3 + $0xc] ss:$16 sps:$4 sm:$0xff]   ;;  %v2142_v48 = vld [vmem:[#allocation3 + $0x8] ss:$16 sps:$4 sm:$0xff]   ;;  %v54_v54 = vld [vmem:[%s2655_s3] sm:$0xf] }
  0x1e   :  { %183 = vmatprep.mubr.f32.mxu0 %v2659_v0  ;;  %296 = vmatprep.mubr.f32.mxu1 %v2659_v0  ;;  %v59_v61 = vrot.slane %v54_v54, %v58_v52  ;;  %v2203_v62 = vrot.slane %v54_v54, %v66_v53  ;;  %v63_v2 = vrot.slane %v54_v54, %v62_v57 }
  0x1f   :  { %1574 = vmatmul.mubr.msk.f32.gmra.mxu0 %vm76_vm0, %v41_v24  ;;  %1582 = vmatmul.mubr.msk.f32.gmra.mxu1 %vm76_vm0, %v41_v24  ;;  %v2205_v3 = vrot.slane %v54_v54, %v70_v58 }
  0x20   :  { %557 = vmatprep.subr.bf16.mxu0 %v2058_v25  ;;  %598 = vmatprep.subr.bf16.mxu1 %v2060_v26 }
  0x21   :  { %558 = vmatpush1.bf16.msra.mxu0 %v2062_v27  ;;  %599 = vmatpush1.bf16.msra.mxu1 %v2066_v28 }
  0x22   :  { %189 = vmatprep.mubr.f32.mxu0 %v2659_v0  ;;  %302 = vmatprep.mubr.f32.mxu1 %v2659_v0 }
  0x23   :  { %1575 = vmatmul.mubr.msk.f32.gmra.mxu0 %vm76_vm0, %v42_v29  ;;  %1583 = vmatmul.mubr.msk.f32.gmra.mxu1 %vm76_vm0, %v42_v29 }
  0x24   :  { %559 = vmatprep.subr.bf16.mxu0 %v2075_v30  ;;  %600 = vmatprep.subr.bf16.mxu1 %v2077_v31 }
  0x25   :  { %560 = vmatpush1.bf16.msra.mxu0 %v2081_v32  ;;  %601 = vmatpush1.bf16.msra.mxu1 %v2085_v33 }
  0x26   :  { %195 = vmatprep.mubr.f32.mxu0 %v2659_v0  ;;  %308 = vmatprep.mubr.f32.mxu1 %v2659_v0 }
  0x27   :  { %1576 = vmatmul.mubr.msk.f32.gmra.mxu0 %vm76_vm0, %v43_v34  ;;  %1584 = vmatmul.mubr.msk.f32.gmra.mxu1 %vm76_vm0, %v43_v34 }
  0x28   :  { %561 = vmatprep.subr.bf16.mxu0 %v2094_v35  ;;  %602 = vmatprep.subr.bf16.mxu1 %v2098_v36 }
  0x29   :  { %562 = vmatpush1.bf16.msra.mxu0 %v2102_v37  ;;  %603 = vmatpush1.bf16.msra.mxu1 %v2104_v38 }
  0x2a   :  { %201 = vmatprep.mubr.f32.mxu0 %v2659_v0  ;;  %314 = vmatprep.mubr.f32.mxu1 %v2659_v0 }
  0x2b   :  { %1577 = vmatmul.mubr.msk.f32.gmra.mxu0 %vm76_vm0, %v44_v39  ;;  %1585 = vmatmul.mubr.msk.f32.gmra.mxu1 %vm76_vm0, %v44_v39 }
  0x2c   :  { %563 = vmatprep.subr.bf16.mxu0 %v2115_v40  ;;  %604 = vmatprep.subr.bf16.mxu1 %v2117_v41 }
  0x2d   :  { %564 = vmatpush1.bf16.msra.mxu0 %v2121_v42  ;;  %605 = vmatpush1.bf16.msra.mxu1 %v2123_v43 }
  0x2e   :  { %207 = vmatprep.mubr.f32.mxu0 %v2659_v0  ;;  %320 = vmatprep.mubr.f32.mxu1 %v2659_v0 }
  0x2f   :  { %1578 = vmatmul.mubr.msk.f32.gmra.mxu0 %vm76_vm0, %v45_v44  ;;  %1586 = vmatmul.mubr.msk.f32.gmra.mxu1 %vm76_vm0, %v45_v44 }
  0x30   :  { %565 = vmatprep.subr.bf16.mxu0 %v2134_v45  ;;  %606 = vmatprep.subr.bf16.mxu1 %v2136_v46 }
  0x31   :  { %566 = vmatpush1.bf16.msra.mxu0 %v2140_v47  ;;  %607 = vmatpush1.bf16.msra.mxu1 %v2142_v48 }
  0x32   :  { %583 = vmatprep.mubr.bf16.mxu0 %v2661_v49  ;;  %624 = vmatprep.mubr.bf16.mxu1 %v2661_v49 }
  0x33   :  { %666 = vmatprep.subr.bf16.mxu0 %v2005_v10  ;;  %707 = vmatprep.subr.bf16.mxu1 %v2007_v11 }
  0x34   :  { %584 = vmatmul.mubr.bf16.vlgmr.msra.gmra.mxu0 %v2661_v49  ;;  %625 = vmatmul.mubr.bf16.vlgmr.msra.gmra.mxu1 %v2661_v49 }
  0x35   :  { %667 = vmatpush1.bf16.msra.mxu0 %v2011_v12  ;;  %708 = vmatpush1.bf16.msra.mxu1 %v2013_v13 }
  0x36   :  { %668 = vmatprep.subr.bf16.mxu0 %v2020_v15  ;;  %709 = vmatprep.subr.bf16.mxu1 %v2024_v16 }
  0x37   :  { %698 = vmatprep.mubr.bf16.mxu0 %v2661_v49  ;;  %739 = vmatprep.mubr.bf16.mxu1 %v2661_v49 }
  0x39   :  { %669 = vmatpush1.bf16.msra.mxu0 %v2028_v17  ;;  %710 = vmatpush1.bf16.msra.mxu1 %v2030_v18 }
  0x3a   :  { %670 = vmatprep.subr.bf16.mxu0 %v2037_v20  ;;  %711 = vmatprep.subr.bf16.mxu1 %v2041_v21 }
  0x3d   :  { %671 = vmatpush1.bf16.msra.mxu0 %v2045_v22  ;;  %712 = vmatpush1.bf16.msra.mxu1 %v2047_v23 }
  0x3e   :  { %672 = vmatprep.subr.bf16.mxu0 %v2058_v25  ;;  %713 = vmatprep.subr.bf16.mxu1 %v2060_v26 }
  0x41   :  { %673 = vmatpush1.bf16.msra.mxu0 %v2062_v27  ;;  %714 = vmatpush1.bf16.msra.mxu1 %v2066_v28 }
  0x42   :  { %674 = vmatprep.subr.bf16.mxu0 %v2075_v30  ;;  %715 = vmatprep.subr.bf16.mxu1 %v2077_v31 }
  0x45   :  { %675 = vmatpush1.bf16.msra.mxu0 %v2081_v32  ;;  %716 = vmatpush1.bf16.msra.mxu1 %v2085_v33 }
  0x46   :  { %676 = vmatprep.subr.bf16.mxu0 %v2094_v35  ;;  %717 = vmatprep.subr.bf16.mxu1 %v2098_v36 }
  0x49   :  { %677 = vmatpush1.bf16.msra.mxu0 %v2102_v37  ;;  %718 = vmatpush1.bf16.msra.mxu1 %v2104_v38 }
  0x4a   :  { %678 = vmatprep.subr.bf16.mxu0 %v2115_v40  ;;  %719 = vmatprep.subr.bf16.mxu1 %v2117_v41 }
  0x4d   :  { %679 = vmatpush1.bf16.msra.mxu0 %v2121_v42  ;;  %720 = vmatpush1.bf16.msra.mxu1 %v2123_v43 }
  0x4e   :  { %680 = vmatprep.subr.bf16.mxu0 %v2134_v45  ;;  %721 = vmatprep.subr.bf16.mxu1 %v2136_v46 }
  0x51   :  { %681 = vmatpush1.bf16.msra.mxu0 %v2140_v47  ;;  %722 = vmatpush1.bf16.msra.mxu1 %v2142_v48 }
  0x52   :  { %781 = vmatprep.subr.bf16.mxu0 %v2005_v10  ;;  %822 = vmatprep.subr.bf16.mxu1 %v2007_v11 }
  0xd3   :  { %v2195_v55 = vpop.f32.mrf.mxu0  ;;  %v2197_v56 = vpop.f32.mrf.mxu1 }
  0xd5   :  { %v2199_v59 = vpop.f32.mrf.mxu0  ;;  %v2201_v60 = vpop.f32.mrf.mxu1 }
  0xd7   :  { %v173_v63 = vpop.f32.mrf.mxu0  ;;  %v286_v1 = vpop.f32.mrf.mxu1 }
  0xd8   :  { %v2207_v4 = vadd.f32 %v173_v63, %v59_v61  ;;  %v2210_v5 = vadd.f32 %v286_v1, %v2203_v62 }
  0xd9   :  { %v175_v6 = vpop.f32.mrf.mxu0  ;;  %v288_v7 = vpop.f32.mrf.mxu1 }
  0xda   :  { %v2212_v8 = vadd.f32 %v175_v6, %v63_v2  ;;  %v2215_v9 = vadd.f32 %v288_v7, %v2205_v3 }
  0xdb   :  { %v179_v14 = vpop.f32.mrf.mxu0  ;;  %v292_v19 = vpop.f32.mrf.mxu1 }
  0xdc   :  { %v2217_v24 = vadd.f32 %v179_v14, %v59_v61  ;;  %v2220_v29 = vadd.f32 %v292_v19, %v2203_v62 }
  0xdd   :  { %v181_v34 = vpop.f32.mrf.mxu0  ;;  %v294_v39 = vpop.f32.mrf.mxu1 }
  0xde   :  { %v2222_v44 = vadd.f32 %v181_v34, %v63_v2  ;;  %v2225_v50 = vadd.f32 %v294_v39, %v2205_v3 }
  0xdf   :  { %v185_v51 = vpop.f32.mrf.mxu0  ;;  %v298_v52 = vpop.f32.mrf.mxu1 }
  0xe0   :  { %v2227_v53 = vadd.f32 %v185_v51, %v59_v61  ;;  %v2230_v54 = vadd.f32 %v298_v52, %v2203_v62 }
  0xe1   :  { %v187_v57 = vpop.f32.mrf.mxu0  ;;  %v300_v58 = vpop.f32.mrf.mxu1 }
  0xe2   :  { %2663 = vst [vmem:[#allocation6_spill] sm:$0xff] %v2227_v53  ;;  %2664 = vst [vmem:[#allocation7_spill] sm:$0xff] %v2230_v54  ;;  %v2232_v63 = vadd.f32 %v187_v57, %v63_v2  ;;  %v2235_v1 = vadd.f32 %v300_v58, %v2205_v3 }
  0xe3   :  { %v191_v6 = vpop.f32.mrf.mxu0  ;;  %v304_v7 = vpop.f32.mrf.mxu1 }
  0xe4   :  { %2665 = vst [vmem:[#allocation8_spill] sm:$0xff] %v2232_v63  ;;  %2666 = vst [vmem:[#allocation9_spill] sm:$0xff] %v2235_v1  ;;  %v2237_v14 = vadd.f32 %v191_v6, %v59_v61  ;;  %v2240_v19 = vadd.f32 %v304_v7, %v2203_v62 }
  0xe5   :  { %v193_v34 = vpop.f32.mrf.mxu0  ;;  %v306_v39 = vpop.f32.mrf.mxu1 }
  0xe6   :  { %2667 = vst [vmem:[#allocation10_spill] sm:$0xff] %v2237_v14  ;;  %2668 = vst [vmem:[#allocation11_spill] sm:$0xff] %v2240_v19  ;;  %v2242_v51 = vadd.f32 %v193_v34, %v63_v2  ;;  %v2245_v52 = vadd.f32 %v306_v39, %v2205_v3 }
  0xe7   :  { %v197_v0 = vpop.f32.mrf.mxu0  ;;  %v310_v57 = vpop.f32.mrf.mxu1 }
  0xe8   :  { %2669 = vst [vmem:[#allocation12_spill] sm:$0xff] %v2242_v51  ;;  %2670 = vst [vmem:[#allocation13_spill] sm:$0xff] %v2245_v52  ;;  %v2247_v49 = vadd.f32 %v197_v0, %v59_v61  ;;  %v2250_v58 = vadd.f32 %v310_v57, %v2203_v62 }
  0xe9   :  { %v199_v1 = vpop.f32.mrf.mxu0  ;;  %v312_v6 = vpop.f32.mrf.mxu1 }
  0xea   :  { %2671 = vst [vmem:[#allocation14_spill] sm:$0xff] %v2247_v49  ;;  %2672 = vst [vmem:[#allocation15_spill] sm:$0xff] %v2250_v58  ;;  %v2252_v14 = vadd.f32 %v199_v1, %v63_v2  ;;  %v2255_v7 = vadd.f32 %v312_v6, %v2205_v3 }
  0xeb   :  { %v203_v19 = vpop.f32.mrf.mxu0  ;;  %v316_v34 = vpop.f32.mrf.mxu1 }
  0xec   :  { %2673 = vst [vmem:[#allocation16_spill] sm:$0xff] %v2252_v14  ;;  %2674 = vst [vmem:[#allocation17_spill] sm:$0xff] %v2255_v7  ;;  %v2257_v51 = vadd.f32 %v203_v19, %v59_v61  ;;  %v2260_v39 = vadd.f32 %v316_v34, %v2203_v62 }
  0xed   :  { %v205_v52 = vpop.f32.mrf.mxu0  ;;  %v318_v0 = vpop.f32.mrf.mxu1 }
  0xee   :  { %2675 = vst [vmem:[#allocation18_spill] sm:$0xff] %v2257_v51  ;;  %2676 = vst [vmem:[#allocation19_spill] sm:$0xff] %v2260_v39  ;;  %v2262_v49 = vadd.f32 %v205_v52, %v63_v2  ;;  %v2265_v57 = vadd.f32 %v318_v0, %v2205_v3  ;;  %v168_v52 = vadd.f32 %v2195_v55, %v59_v61 }
  0xef   :  { %v209_v58 = vpop.f32.mrf.mxu0  ;;  %v322_v1 = vpop.f32.mrf.mxu1  ;;  %v170_v0 = vadd.f32 %v2199_v59, %v63_v2 }
  0xf0   :  { %2677 = vst [vmem:[#allocation20_spill] sm:$0xff] %v2262_v49  ;;  %2678 = vst [vmem:[#allocation21_spill] sm:$0xff] %v2265_v57  ;;  %v2267_v14 = vadd.f32 %v209_v58, %v59_v61  ;;  %v2270_v6 = vadd.f32 %v322_v1, %v2203_v62  ;;  %v283_v61 = vadd.f32 %v2201_v60, %v2205_v3 }
  0xf1   :  { %v211_v7 = vpop.f32.mrf.mxu0  ;;  %v324_v19 = vpop.f32.mrf.mxu1 }
  0xf2   :  { %2679 = vst [vmem:[#allocation22_spill] sm:$0xff] %v2267_v14  ;;  %2680 = vst [vmem:[#allocation23_spill] sm:$0xff] %v2270_v6  ;;  %v2272_v51 = vadd.f32 %v211_v7, %v63_v2  ;;  %v2275_v34 = vadd.f32 %v324_v19, %v2205_v3  ;;  %v281_v19 = vadd.f32 %v2197_v56, %v2203_v62 }
  0xf4   :  { %2681 = vst [vmem:[#allocation24_spill] sm:$0xff] %v2272_v51  ;;  %v585_v39 = vpop.f32.mrf.mxu0  ;;  %v626_v49 = vpop.f32.mrf.mxu1 }
  0xf5   :  { %v637_v57 = vadd.f32 %v585_v39, %v168_v52  ;;  %v639_v55 = vadd.f32 %v626_v49, %v281_v19 }
  0xf6   :  { %v587_v54 = vpop.f32.mrf.mxu0  ;;  %v628_v58 = vpop.f32.mrf.mxu1 }
  0xf7   :  { %v1619_v14 = vmul.f32 -1.442695, %v637_v57  ;;  %v638_v63 = vadd.f32 %v587_v54, %v170_v0  ;;  %v1621_v59 = vmul.f32 -1.442695, %v639_v55  ;;  %v640_v39 = vadd.f32 %v628_v58, %v283_v61 }
  0xf8   :  { %v589_v1 = vpop.f32.mrf.mxu0  ;;  %v630_v6 = vpop.f32.mrf.mxu1 }
  0xf9   :  { %1750 = vpow2.f32 %v1619_v14  ;;  %v1620_v53 = vmul.f32 -1.442695, %v638_v63  ;;  %v2682_v1 = vmov 0  }
  0xfa   :  { %v590_v7 = vpop.f32.mrf.mxu0  ;;  %v631_v51 = vpop.f32.mrf.mxu1 }
  0xfb   :  { %1752 = vpow2.f32 %v1620_v53 }
  0xfc   :  { %1754 = vpow2.f32 %v1621_v59 }
 0x106   :  { %v1751_v2 = vpop.eup %1750 }
 0x107   :  { %v650_v52 = vadd.f32 1.0, %v1751_v2 }
 0x108   :  { %v1753_v57 = vpop.eup %1752 }
 0x109   :  { %1756 = vrcp.f32 %v650_v52  ;;  %v651_v54 = vadd.f32 1.0, %v1753_v57  ;;  %v1755_v63 = vpop.eup %1754 }
 0x10a   :  { %1758 = vtanh.f32 %v640_v39  ;;  %v652_v6 = vadd.f32 1.0, %v1755_v63 }
 0x10b   :  { %1760 = vrcp.f32 %v651_v54 }
 0x10c   :  { %1762 = vrcp.f32 %v652_v6 }
 0x116   :  { %v1757_v14 = vpop.eup %1756 }
 0x117   :  { %v1759_v53 = vpop.eup %1758 }
 0x118   :  { %v1761_v51 = vpop.eup %1760  ;;  %v661_v49 = vmul.f32 %v1759_v53, %v1757_v14 }
 0x119   :  { %v660_v56 = vmul.f32 0.0, %v1761_v51  ;;  %v1763_v60 = vpop.eup %1762 }
 0x11b   :  { %v2283_v62 = vadd.f32 %v661_v49, %v660_v56 }
 0x11d   :  { %1764 = vtanh.f32 %v2283_v62 }
 0x12a   :  { %v1765_v3 = vpop.eup %1764 }
 0x12b   :  { %v664_v0 = vmul.f32 %v1765_v3, %v1763_v60 }
 0x12d   :  { %v665_v58 = vpack.c.bf16 %v664_v0, %v664_v0 }
 0x12f   :  { %699 = vmatmul.mubr.bf16.vlgmr.msra.gmra.mxu0 %v665_v58  ;;  %740 = vmatmul.mubr.bf16.vlgmr.msra.gmra.mxu1 %v665_v58 }
 0x130   :  { %782 = vmatpush1.bf16.msra.mxu0 %v2011_v12  ;;  %823 = vmatpush1.bf16.msra.mxu1 %v2013_v13 }
 0x131   :  { %783 = vmatprep.subr.bf16.mxu0 %v2020_v15  ;;  %824 = vmatprep.subr.bf16.mxu1 %v2024_v16 }
 0x132   :  { %813 = vmatprep.mubr.bf16.mxu0 %v2682_v1  ;;  %854 = vmatprep.mubr.bf16.mxu1 %v2682_v1 }
 0x134   :  { %784 = vmatpush1.bf16.msra.mxu0 %v2028_v17  ;;  %825 = vmatpush1.bf16.msra.mxu1 %v2030_v18 }
 0x135   :  { %785 = vmatprep.subr.bf16.mxu0 %v2037_v20  ;;  %826 = vmatprep.subr.bf16.mxu1 %v2041_v21 }
 0x138   :  { %786 = vmatpush1.bf16.msra.mxu0 %v2045_v22  ;;  %827 = vmatpush1.bf16.msra.mxu1 %v2047_v23 }
 0x139   :  { %787 = vmatprep.subr.bf16.mxu0 %v2058_v25  ;;  %828 = vmatprep.subr.bf16.mxu1 %v2060_v26 }
 0x13c   :  { %788 = vmatpush1.bf16.msra.mxu0 %v2062_v27  ;;  %829 = vmatpush1.bf16.msra.mxu1 %v2066_v28 }
 0x13d   :  { %789 = vmatprep.subr.bf16.mxu0 %v2075_v30  ;;  %830 = vmatprep.subr.bf16.mxu1 %v2077_v31 }
 0x140   :  { %790 = vmatpush1.bf16.msra.mxu0 %v2081_v32  ;;  %831 = vmatpush1.bf16.msra.mxu1 %v2085_v33 }
 0x141   :  { %791 = vmatprep.subr.bf16.mxu0 %v2094_v35  ;;  %832 = vmatprep.subr.bf16.mxu1 %v2098_v36 }
 0x144   :  { %792 = vmatpush1.bf16.msra.mxu0 %v2102_v37  ;;  %833 = vmatpush1.bf16.msra.mxu1 %v2104_v38 }
 0x145   :  { %793 = vmatprep.subr.bf16.mxu0 %v2115_v40  ;;  %834 = vmatprep.subr.bf16.mxu1 %v2117_v41 }
 0x148   :  { %794 = vmatpush1.bf16.msra.mxu0 %v2121_v42  ;;  %835 = vmatpush1.bf16.msra.mxu1 %v2123_v43 }
 0x149   :  { %795 = vmatprep.subr.bf16.mxu0 %v2134_v45  ;;  %836 = vmatprep.subr.bf16.mxu1 %v2136_v46 }
 0x14c   :  { %796 = vmatpush1.bf16.msra.mxu0 %v2140_v47  ;;  %837 = vmatpush1.bf16.msra.mxu1 %v2142_v48 }
 0x14d   :  { %896 = vmatprep.subr.bf16.mxu0 %v2005_v10  ;;  %937 = vmatprep.subr.bf16.mxu1 %v2007_v11 }
 0x1ef   :  { %v700_v7 = vpop.f32.mrf.mxu0  ;;  %v741_v19 = vpop.f32.mrf.mxu1 }
 0x1f0   :  { %v752_v55 = vadd.f32 %v700_v7, %v2207_v4  ;;  %v754_v53 = vadd.f32 %v741_v19, %v2210_v5 }
 0x1f1   :  { %v702_v61 = vpop.f32.mrf.mxu0  ;;  %v743_v59 = vpop.f32.mrf.mxu1 }
 0x1f2   :  { %v1622_v2 = vmul.f32 -1.442695, %v752_v55  ;;  %v753_v39 = vadd.f32 %v702_v61, %v2212_v8  ;;  %v1624_v51 = vmul.f32 -1.442695, %v754_v53  ;;  %v755_v6 = vadd.f32 %v743_v59, %v2215_v9 }
 0x1f3   :  { %v704_v52 = vpop.f32.mrf.mxu0  ;;  %v745_v57 = vpop.f32.mrf.mxu1 }
 0x1f4   :  { %1766 = vpow2.f32 %v1622_v2  ;;  %v1623_v54 = vmul.f32 -1.442695, %v753_v39 }
 0x1f5   :  { %v705_v63 = vpop.f32.mrf.mxu0  ;;  %v746_v14 = vpop.f32.mrf.mxu1 }
 0x1f6   :  { %1768 = vpow2.f32 %v1623_v54 }
 0x1f7   :  { %1770 = vpow2.f32 %v1624_v51 }
 0x1f8   :  { %1772 = vtanh.f32 %v755_v6 }
 0x201   :  { %v1767_v56 = vpop.eup %1766 }
 0x202   :  { %v765_v49 = vadd.f32 1.0, %v1767_v56 }
 0x203   :  { %v1769_v4 = vpop.eup %1768 }
 0x204   :  { %1774 = vrcp.f32 %v765_v49  ;;  %v766_v60 = vadd.f32 1.0, %v1769_v4  ;;  %v1771_v8 = vpop.eup %1770 }
 0x205   :  { %v1773_v3 = vpop.eup %1772  ;;  %v767_v55 = vadd.f32 1.0, %v1771_v8 }
 0x206   :  { %1776 = vrcp.f32 %v766_v60 }
 0x207   :  { %1778 = vrcp.f32 %v767_v55 }
 0x211   :  { %v1775_v0 = vpop.eup %1774 }
 0x212   :  { %v776_v58 = vmul.f32 %v1775_v0, %v1773_v3 }
 0x213   :  { %v1777_v7 = vpop.eup %1776 }
 0x214   :  { %v775_v61 = vmul.f32 %v1777_v7, %v2283_v62  ;;  %v1779_v9 = vpop.eup %1778 }
 0x216   :  { %v2325_v5 = vadd.f32 %v776_v58, %v775_v61 }
 0x218   :  { %1780 = vtanh.f32 %v2325_v5 }
 0x225   :  { %v1781_v19 = vpop.eup %1780 }
 0x226   :  { %v779_v59 = vmul.f32 %v1781_v19, %v1779_v9 }
 0x228   :  { %v780_v2 = vpack.c.bf16 %v779_v59, %v779_v59 }
 0x22a   :  { %814 = vmatmul.mubr.bf16.vlgmr.msra.gmra.mxu0 %v780_v2  ;;  %855 = vmatmul.mubr.bf16.vlgmr.msra.gmra.mxu1 %v780_v2 }
 0x22b   :  { %897 = vmatpush1.bf16.msra.mxu0 %v2011_v12  ;;  %938 = vmatpush1.bf16.msra.mxu1 %v2013_v13 }
 0x22c   :  { %898 = vmatprep.subr.bf16.mxu0 %v2020_v15  ;;  %939 = vmatprep.subr.bf16.mxu1 %v2024_v16 }
 0x22d   :  { %928 = vmatprep.mubr.bf16.mxu0 %v2682_v1  ;;  %969 = vmatprep.mubr.bf16.mxu1 %v2682_v1 }
 0x22f   :  { %899 = vmatpush1.bf16.msra.mxu0 %v2028_v17  ;;  %940 = vmatpush1.bf16.msra.mxu1 %v2030_v18 }
 0x230   :  { %900 = vmatprep.subr.bf16.mxu0 %v2037_v20  ;;  %941 = vmatprep.subr.bf16.mxu1 %v2041_v21 }
 0x233   :  { %901 = vmatpush1.bf16.msra.mxu0 %v2045_v22  ;;  %942 = vmatpush1.bf16.msra.mxu1 %v2047_v23 }
 0x234   :  { %902 = vmatprep.subr.bf16.mxu0 %v2058_v25  ;;  %943 = vmatprep.subr.bf16.mxu1 %v2060_v26 }
 0x237   :  { %903 = vmatpush1.bf16.msra.mxu0 %v2062_v27  ;;  %944 = vmatpush1.bf16.msra.mxu1 %v2066_v28 }
 0x238   :  { %904 = vmatprep.subr.bf16.mxu0 %v2075_v30  ;;  %945 = vmatprep.subr.bf16.mxu1 %v2077_v31 }
 0x23b   :  { %905 = vmatpush1.bf16.msra.mxu0 %v2081_v32  ;;  %946 = vmatpush1.bf16.msra.mxu1 %v2085_v33 }
 0x23c   :  { %906 = vmatprep.subr.bf16.mxu0 %v2094_v35  ;;  %947 = vmatprep.subr.bf16.mxu1 %v2098_v36 }
 0x23f   :  { %907 = vmatpush1.bf16.msra.mxu0 %v2102_v37  ;;  %948 = vmatpush1.bf16.msra.mxu1 %v2104_v38 }
 0x240   :  { %908 = vmatprep.subr.bf16.mxu0 %v2115_v40  ;;  %949 = vmatprep.subr.bf16.mxu1 %v2117_v41 }
 0x243   :  { %909 = vmatpush1.bf16.msra.mxu0 %v2121_v42  ;;  %950 = vmatpush1.bf16.msra.mxu1 %v2123_v43 }
 0x244   :  { %910 = vmatprep.subr.bf16.mxu0 %v2134_v45  ;;  %951 = vmatprep.subr.bf16.mxu1 %v2136_v46 }
 0x247   :  { %911 = vmatpush1.bf16.msra.mxu0 %v2140_v47  ;;  %952 = vmatpush1.bf16.msra.mxu1 %v2142_v48 }
 0x248   :  { %1011 = vmatprep.subr.bf16.mxu0 %v2005_v10  ;;  %1052 = vmatprep.subr.bf16.mxu1 %v2007_v11 }
 0x2ea   :  { %v815_v62 = vpop.f32.mrf.mxu0  ;;  %v856_v39 = vpop.f32.mrf.mxu1 }
 0x2eb   :  { %v867_v52 = vadd.f32 %v815_v62, %v2217_v24  ;;  %v869_v4 = vadd.f32 %v856_v39, %v2220_v29 }
 0x2ec   :  { %v817_v57 = vpop.f32.mrf.mxu0  ;;  %v858_v54 = vpop.f32.mrf.mxu1 }
 0x2ed   :  { %v1625_v63 = vmul.f32 -1.442695, %v867_v52  ;;  %v868_v14 = vadd.f32 %v817_v57, %v2222_v44  ;;  %v1627_v60 = vmul.f32 -1.442695, %v869_v4  ;;  %v870_v8 = vadd.f32 %v858_v54, %v2225_v50  ;;  %v2683_v57 = vld [vmem:[#allocation6_spill] sm:$0xff] }
 0x2ee   :  { %v819_v53 = vpop.f32.mrf.mxu0  ;;  %v860_v51 = vpop.f32.mrf.mxu1 }
 0x2ef   :  { %1782 = vpow2.f32 %v1625_v63  ;;  %v1626_v6 = vmul.f32 -1.442695, %v868_v14  ;;  %v2684_v51 = vld [vmem:[#allocation8_spill] sm:$0xff] }
 0x2f0   :  { %v820_v56 = vpop.f32.mrf.mxu0  ;;  %v861_v49 = vpop.f32.mrf.mxu1 }
 0x2f1   :  { %1784 = vpow2.f32 %v1626_v6 }
 0x2f2   :  { %1786 = vpow2.f32 %v1627_v60 }
 0x2f3   :  { %1788 = vtanh.f32 %v870_v8 }
 0x2fc   :  { %v1783_v3 = vpop.eup %1782 }
 0x2fd   :  { %v880_v0 = vadd.f32 1.0, %v1783_v3  ;;  %v2685_v3 = vld [vmem:[#allocation7_spill] sm:$0xff] }
 0x2fe   :  { %v1785_v24 = vpop.eup %1784 }
 0x2ff   :  { %1790 = vrcp.f32 %v880_v0  ;;  %v881_v58 = vadd.f32 1.0, %v1785_v24  ;;  %v1787_v44 = vpop.eup %1786 }
 0x300   :  { %v1789_v7 = vpop.eup %1788  ;;  %v882_v19 = vadd.f32 1.0, %v1787_v44 }
 0x301   :  { %1792 = vrcp.f32 %v881_v58 }
 0x302   :  { %1794 = vrcp.f32 %v882_v19 }
 0x30c   :  { %v1791_v55 = vpop.eup %1790 }
 0x30d   :  { %v891_v61 = vmul.f32 %v1791_v55, %v1789_v7 }
 0x30e   :  { %v1793_v9 = vpop.eup %1792 }
 0x30f   :  { %v890_v59 = vmul.f32 %v1793_v9, %v2325_v5  ;;  %v1795_v50 = vpop.eup %1794 }
 0x311   :  { %v2367_v29 = vadd.f32 %v891_v61, %v890_v59 }
 0x313   :  { %1796 = vtanh.f32 %v2367_v29 }
 0x320   :  { %v1797_v2 = vpop.eup %1796 }
 0x321   :  { %v894_v62 = vmul.f32 %v1797_v2, %v1795_v50 }
 0x323   :  { %v895_v39 = vpack.c.bf16 %v894_v62, %v894_v62 }
 0x325   :  { %929 = vmatmul.mubr.bf16.vlgmr.msra.gmra.mxu0 %v895_v39  ;;  %970 = vmatmul.mubr.bf16.vlgmr.msra.gmra.mxu1 %v895_v39 }
 0x326   :  { %1012 = vmatpush1.bf16.msra.mxu0 %v2011_v12  ;;  %1053 = vmatpush1.bf16.msra.mxu1 %v2013_v13 }
 0x327   :  { %1013 = vmatprep.subr.bf16.mxu0 %v2020_v15  ;;  %1054 = vmatprep.subr.bf16.mxu1 %v2024_v16 }
 0x328   :  { %1043 = vmatprep.mubr.bf16.mxu0 %v2682_v1  ;;  %1084 = vmatprep.mubr.bf16.mxu1 %v2682_v1 }
 0x32a   :  { %1014 = vmatpush1.bf16.msra.mxu0 %v2028_v17  ;;  %1055 = vmatpush1.bf16.msra.mxu1 %v2030_v18 }
 0x32b   :  { %1015 = vmatprep.subr.bf16.mxu0 %v2037_v20  ;;  %1056 = vmatprep.subr.bf16.mxu1 %v2041_v21 }
 0x32e   :  { %1016 = vmatpush1.bf16.msra.mxu0 %v2045_v22  ;;  %1057 = vmatpush1.bf16.msra.mxu1 %v2047_v23 }
 0x32f   :  { %1017 = vmatprep.subr.bf16.mxu0 %v2058_v25  ;;  %1058 = vmatprep.subr.bf16.mxu1 %v2060_v26 }
 0x332   :  { %1018 = vmatpush1.bf16.msra.mxu0 %v2062_v27  ;;  %1059 = vmatpush1.bf16.msra.mxu1 %v2066_v28 }
 0x333   :  { %1019 = vmatprep.subr.bf16.mxu0 %v2075_v30  ;;  %1060 = vmatprep.subr.bf16.mxu1 %v2077_v31 }
 0x336   :  { %1020 = vmatpush1.bf16.msra.mxu0 %v2081_v32  ;;  %1061 = vmatpush1.bf16.msra.mxu1 %v2085_v33 }
 0x337   :  { %1021 = vmatprep.subr.bf16.mxu0 %v2094_v35  ;;  %1062 = vmatprep.subr.bf16.mxu1 %v2098_v36 }
 0x33a   :  { %1022 = vmatpush1.bf16.msra.mxu0 %v2102_v37  ;;  %1063 = vmatpush1.bf16.msra.mxu1 %v2104_v38 }
 0x33b   :  { %1023 = vmatprep.subr.bf16.mxu0 %v2115_v40  ;;  %1064 = vmatprep.subr.bf16.mxu1 %v2117_v41 }
 0x33e   :  { %1024 = vmatpush1.bf16.msra.mxu0 %v2121_v42  ;;  %1065 = vmatpush1.bf16.msra.mxu1 %v2123_v43 }
 0x33f   :  { %1025 = vmatprep.subr.bf16.mxu0 %v2134_v45  ;;  %1066 = vmatprep.subr.bf16.mxu1 %v2136_v46 }
 0x342   :  { %1026 = vmatpush1.bf16.msra.mxu0 %v2140_v47  ;;  %1067 = vmatpush1.bf16.msra.mxu1 %v2142_v48 }
 0x343   :  { %1126 = vmatprep.subr.bf16.mxu0 %v2005_v10  ;;  %1167 = vmatprep.subr.bf16.mxu1 %v2007_v11  ;;  %v2686_v11 = vld [vmem:[#allocation9_spill] sm:$0xff] }
 0x3e5   :  { %v930_v5 = vpop.f32.mrf.mxu0  ;;  %v971_v52 = vpop.f32.mrf.mxu1 }
 0x3e6   :  { %v982_v54 = vadd.f32 %v930_v5, %v2683_v57  ;;  %v984_v10 = vadd.f32 %v971_v52, %v2685_v3 }
 0x3e7   :  { %v932_v63 = vpop.f32.mrf.mxu0  ;;  %v973_v14 = vpop.f32.mrf.mxu1 }
 0x3e8   :  { %v1628_v53 = vmul.f32 -1.442695, %v982_v54  ;;  %v983_v6 = vadd.f32 %v932_v63, %v2684_v51  ;;  %v1630_v0 = vmul.f32 -1.442695, %v984_v10  ;;  %v985_v24 = vadd.f32 %v973_v14, %v2686_v11 }
 0x3e9   :  { %v934_v56 = vpop.f32.mrf.mxu0  ;;  %v975_v49 = vpop.f32.mrf.mxu1 }
 0x3ea   :  { %1798 = vpow2.f32 %v1628_v53  ;;  %v1629_v4 = vmul.f32 -1.442695, %v983_v6 }
 0x3eb   :  { %v935_v60 = vpop.f32.mrf.mxu0  ;;  %v976_v8 = vpop.f32.mrf.mxu1 }
 0x3ec   :  { %1800 = vpow2.f32 %v1629_v4 }
 0x3ed   :  { %1802 = vpow2.f32 %v1630_v0 }
 0x3ee   :  { %1804 = vtanh.f32 %v985_v24  ;;  %v2458_v24 = vld [vmem:[#allocation3 + $0xe0] ss:$16 sps:$4 sm:$0xff]  }
 0x3f7   :  { %v1799_v58 = vpop.eup %1798 }
 0x3f8   :  { %v995_v44 = vadd.f32 1.0, %v1799_v58  ;;  %v2461_v58 = vld [vmem:[#allocation3 + $0xe8] ss:$16 sps:$4 sm:$0xff]  }
 0x3f9   :  { %v1801_v7 = vpop.eup %1800 }
 0x3fa   :  { %1806 = vrcp.f32 %v995_v44  ;;  %v996_v55 = vadd.f32 1.0, %v1801_v7  ;;  %v1803_v61 = vpop.eup %1802  ;;  %v2464_v44 = vld [vmem:[#allocation3 + $0xc4] ss:$16 sps:$4 sm:$0xff]   ;;  %v2467_v7 = vld [vmem:[#allocation3 + $0xcc] ss:$16 sps:$4 sm:$0xff]  }
 0x3fb   :  { %v1805_v9 = vpop.eup %1804  ;;  %v997_v2 = vadd.f32 1.0, %v1803_v61  ;;  %v2475_v61 = vld [vmem:[#allocation3 + $0xc8] ss:$16 sps:$4 sm:$0xff]  }
 0x3fc   :  { %1808 = vrcp.f32 %v996_v55  ;;  %v2472_v55 = vld [vmem:[#allocation3 + $0xc0] ss:$16 sps:$4 sm:$0xff]  }
 0x3fd   :  { %1810 = vrcp.f32 %v997_v2  ;;  %v2490_v2 = vld [vmem:[#allocation3 + $0x84] ss:$16 sps:$4 sm:$0xff]  }
 0x407   :  { %v1807_v19 = vpop.eup %1806 }
 0x408   :  { %v1006_v59 = vmul.f32 %v1807_v19, %v1805_v9  ;;  %v2478_v9 = vld [vmem:[#allocation3 + $0xa4] ss:$16 sps:$4 sm:$0xff]   ;;  %v2481_v19 = vld [vmem:[#allocation3 + $0xac] ss:$16 sps:$4 sm:$0xff]  }
 0x409   :  { %v1809_v50 = vpop.eup %1808 }
 0x40a   :  { %v1005_v62 = vmul.f32 %v1809_v50, %v2367_v29  ;;  %v1811_v5 = vpop.eup %1810  ;;  %v2487_v50 = vld [vmem:[#allocation3 + $0xa8] ss:$16 sps:$4 sm:$0xff]  }
 0x40c   :  { %v2409_v39 = vadd.f32 %v1006_v59, %v1005_v62  ;;  %v2484_v59 = vld [vmem:[#allocation3 + $0xa0] ss:$16 sps:$4 sm:$0xff]   ;;  %v2493_v62 = vld [vmem:[#allocation3 + $0x8c] ss:$16 sps:$4 sm:$0xff]  }
 0x40e   :  { %1812 = vtanh.f32 %v2409_v39 }
 0x41b   :  { %v1813_v52 = vpop.eup %1812 }
 0x41c   :  { %v1009_v57 = vmul.f32 %v1813_v52, %v1811_v5  ;;  %v2499_v5 = vld [vmem:[#allocation3 + $0x88] ss:$16 sps:$4 sm:$0xff]   ;;  %v2502_v52 = vld [vmem:[#allocation3 + $0x64] ss:$16 sps:$4 sm:$0xff]  }
 0x41e   :  { %v1010_v54 = vpack.c.bf16 %v1009_v57, %v1009_v57  ;;  %v2505_v57 = vld [vmem:[#allocation3 + $0x6c] ss:$16 sps:$4 sm:$0xff]  }
 0x420   :  { %1044 = vmatmul.mubr.bf16.vlgmr.msra.gmra.mxu0 %v1010_v54  ;;  %1085 = vmatmul.mubr.bf16.vlgmr.msra.gmra.mxu1 %v1010_v54  ;;  %v2508_v54 = vld [vmem:[#allocation3 + $0x60] ss:$16 sps:$4 sm:$0xff]  }
 0x421   :  { %1127 = vmatpush1.bf16.msra.mxu0 %v2011_v12  ;;  %1168 = vmatpush1.bf16.msra.mxu1 %v2013_v13  ;;  %v2444_v12 = vld [vmem:[#allocation3 + $0xe4] ss:$16 sps:$4 sm:$0xff]   ;;  %v2447_v13 = vld [vmem:[#allocation3 + $0xec] ss:$16 sps:$4 sm:$0xff]  }
 0x422   :  { %1128 = vmatprep.subr.bf16.mxu0 %v2020_v15  ;;  %1169 = vmatprep.subr.bf16.mxu1 %v2024_v16 }
 0x423   :  { %1158 = vmatprep.mubr.bf16.mxu0 %v2682_v1  ;;  %1199 = vmatprep.mubr.bf16.mxu1 %v2682_v1 }
 0x425   :  { %1129 = vmatpush1.bf16.msra.mxu0 %v2028_v17  ;;  %1170 = vmatpush1.bf16.msra.mxu1 %v2030_v18  ;;  %v2687_v17 = vld [vmem:[#allocation10_spill] sm:$0xff] }
 0x426   :  { %1130 = vmatprep.subr.bf16.mxu0 %v2037_v20  ;;  %1171 = vmatprep.subr.bf16.mxu1 %v2041_v21 }
 0x429   :  { %1131 = vmatpush1.bf16.msra.mxu0 %v2045_v22  ;;  %1172 = vmatpush1.bf16.msra.mxu1 %v2047_v23  ;;  %v2688_v23 = vld [vmem:[#allocation12_spill] sm:$0xff] }
 0x42a   :  { %1132 = vmatprep.subr.bf16.mxu0 %v2058_v25  ;;  %1173 = vmatprep.subr.bf16.mxu1 %v2060_v26 }
 0x42d   :  { %1133 = vmatpush1.bf16.msra.mxu0 %v2062_v27  ;;  %1174 = vmatpush1.bf16.msra.mxu1 %v2066_v28 }
 0x42e   :  { %1134 = vmatprep.subr.bf16.mxu0 %v2075_v30  ;;  %1175 = vmatprep.subr.bf16.mxu1 %v2077_v31 }
 0x431   :  { %1135 = vmatpush1.bf16.msra.mxu0 %v2081_v32  ;;  %1176 = vmatpush1.bf16.msra.mxu1 %v2085_v33  ;;  %v2689_v32 = vld [vmem:[#allocation11_spill] sm:$0xff] }
 0x432   :  { %1136 = vmatprep.subr.bf16.mxu0 %v2094_v35  ;;  %1177 = vmatprep.subr.bf16.mxu1 %v2098_v36  ;;  %v2690_v36 = vld [vmem:[#allocation13_spill] sm:$0xff] }
 0x435   :  { %1137 = vmatpush1.bf16.msra.mxu0 %v2102_v37  ;;  %1178 = vmatpush1.bf16.msra.mxu1 %v2104_v38 }
 0x436   :  { %1138 = vmatprep.subr.bf16.mxu0 %v2115_v40  ;;  %1179 = vmatprep.subr.bf16.mxu1 %v2117_v41 }
 0x439   :  { %1139 = vmatpush1.bf16.msra.mxu0 %v2121_v42  ;;  %1180 = vmatpush1.bf16.msra.mxu1 %v2123_v43 }
 0x43a   :  { %1140 = vmatprep.subr.bf16.mxu0 %v2134_v45  ;;  %1181 = vmatprep.subr.bf16.mxu1 %v2136_v46 }
 0x43d   :  { %1141 = vmatpush1.bf16.msra.mxu0 %v2140_v47  ;;  %1182 = vmatpush1.bf16.msra.mxu1 %v2142_v48 }
 0x43e   :  { %1241 = vmatprep.subr.bf16.mxu0 %v2444_v12  ;;  %1282 = vmatprep.subr.bf16.mxu1 %v2447_v13 }
 0x4e0   :  { %v1045_v15 = vpop.f32.mrf.mxu0  ;;  %v1086_v16 = vpop.f32.mrf.mxu1 }
 0x4e1   :  { %v1097_v18 = vadd.f32 %v1045_v15, %v2687_v17  ;;  %v1099_v33 = vadd.f32 %v1086_v16, %v2689_v32  ;;  %v2511_v15 = vld [vmem:[#allocation3 + $0x68] ss:$16 sps:$4 sm:$0xff]   ;;  %v2514_v16 = vld [vmem:[#allocation3 + $0x44] ss:$16 sps:$4 sm:$0xff]   ;;  %v2517_v17 = vld [vmem:[#allocation3 + $0x4c] ss:$16 sps:$4 sm:$0xff]  }
 0x4e2   :  { %v1047_v20 = vpop.f32.mrf.mxu0  ;;  %v1088_v21 = vpop.f32.mrf.mxu1 }
 0x4e3   :  { %v1631_v22 = vmul.f32 -1.442695, %v1097_v18  ;;  %v1098_v25 = vadd.f32 %v1047_v20, %v2688_v23  ;;  %v1633_v35 = vmul.f32 -1.442695, %v1099_v33  ;;  %v1100_v37 = vadd.f32 %v1088_v21, %v2690_v36  ;;  %v2520_v18 = vld [vmem:[#allocation3 + $0x40] ss:$16 sps:$4 sm:$0xff]  }
 0x4e4   :  { %v1049_v26 = vpop.f32.mrf.mxu0  ;;  %v1090_v27 = vpop.f32.mrf.mxu1  ;;  %v2523_v20 = vld [vmem:[#allocation3 + $0x48] ss:$16 sps:$4 sm:$0xff]  }
 0x4e5   :  { %1814 = vpow2.f32 %v1631_v22  ;;  %v1632_v28 = vmul.f32 -1.442695, %v1098_v25  ;;  %v2691_v22 = vld [vmem:[#allocation14_spill] sm:$0xff] }
 0x4e6   :  { %v1050_v30 = vpop.f32.mrf.mxu0  ;;  %v1091_v31 = vpop.f32.mrf.mxu1 }
 0x4e7   :  { %1816 = vpow2.f32 %v1632_v28 }
 0x4e8   :  { %1818 = vpow2.f32 %v1633_v35 }
 0x4e9   :  { %1820 = vtanh.f32 %v1100_v37 }
 0x4f2   :  { %v1815_v38 = vpop.eup %1814 }
 0x4f3   :  { %v1110_v29 = vadd.f32 1.0, %v1815_v38 }
 0x4f4   :  { %v1817_v63 = vpop.eup %1816 }
 0x4f5   :  { %1822 = vrcp.f32 %v1110_v29  ;;  %v1111_v14 = vadd.f32 1.0, %v1817_v63  ;;  %v1819_v53 = vpop.eup %1818 }
 0x4f6   :  { %v1821_v51 = vpop.eup %1820  ;;  %v1112_v4 = vadd.f32 1.0, %v1819_v53 }
 0x4f7   :  { %1824 = vrcp.f32 %v1111_v14 }
 0x4f8   :  { %1826 = vrcp.f32 %v1112_v4 }
 0x502   :  { %v1823_v6 = vpop.eup %1822 }
 0x503   :  { %v1121_v56 = vmul.f32 %v1823_v6, %v1821_v51 }
 0x504   :  { %v1825_v49 = vpop.eup %1824 }
 0x505   :  { %v1120_v60 = vmul.f32 %v1825_v49, %v2409_v39  ;;  %v1827_v3 = vpop.eup %1826  ;;  %v2496_v39 = vld [vmem:[#allocation3 + $0x80] ss:$16 sps:$4 sm:$0xff]  }
 0x507   :  { %v2455_v8 = vadd.f32 %v1121_v56, %v1120_v60 }
 0x509   :  { %1828 = vtanh.f32 %v2455_v8 }
 0x516   :  { %v1829_v10 = vpop.eup %1828 }
 0x517   :  { %v1124_v0 = vmul.f32 %v1829_v10, %v1827_v3  ;;  %v1904_v3 = vld [vmem:[#allocation3 + $0x20] ss:$16 sps:$4 sm:$0xff]   ;;  %v1905_v10 = vld [vmem:[#allocation3 + $0x28] ss:$16 sps:$4 sm:$0xff]  }
 0x519   :  { %v1125_v11 = vpack.c.bf16 %v1124_v0, %v1124_v0  ;;  %v1906_v0 = vld [vmem:[#allocation3 + $0x4] ss:$16 sps:$4 sm:$0xff]  }
 0x51b   :  { %1159 = vmatmul.mubr.bf16.vlgmr.msra.gmra.mxu0 %v1125_v11  ;;  %1200 = vmatmul.mubr.bf16.vlgmr.msra.gmra.mxu1 %v1125_v11  ;;  %v1907_v11 = vld [vmem:[#allocation3 + $0xc] ss:$16 sps:$4 sm:$0xff]  }
 0x51c   :  { %1242 = vmatpush1.bf16.msra.mxu0 %v2458_v24  ;;  %1283 = vmatpush1.bf16.msra.mxu1 %v2461_v58 }
 0x51d   :  { %1243 = vmatprep.subr.bf16.mxu0 %v2464_v44  ;;  %1284 = vmatprep.subr.bf16.mxu1 %v2467_v7 }
 0x51e   :  { %1273 = vmatprep.mubr.bf16.mxu0 %v2682_v1  ;;  %1314 = vmatprep.mubr.bf16.mxu1 %v2682_v1 }
 0x520   :  { %1244 = vmatpush1.bf16.msra.mxu0 %v2472_v55  ;;  %1285 = vmatpush1.bf16.msra.mxu1 %v2475_v61 }
 0x521   :  { %1245 = vmatprep.subr.bf16.mxu0 %v2478_v9  ;;  %1286 = vmatprep.subr.bf16.mxu1 %v2481_v19 }
 0x524   :  { %1246 = vmatpush1.bf16.msra.mxu0 %v2484_v59  ;;  %1287 = vmatpush1.bf16.msra.mxu1 %v2487_v50 }
 0x525   :  { %1247 = vmatprep.subr.bf16.mxu0 %v2490_v2  ;;  %1288 = vmatprep.subr.bf16.mxu1 %v2493_v62 }
 0x528   :  { %1248 = vmatpush1.bf16.msra.mxu0 %v2496_v39  ;;  %1289 = vmatpush1.bf16.msra.mxu1 %v2499_v5 }
 0x529   :  { %1249 = vmatprep.subr.bf16.mxu0 %v2502_v52  ;;  %1290 = vmatprep.subr.bf16.mxu1 %v2505_v57 }
 0x52c   :  { %1250 = vmatpush1.bf16.msra.mxu0 %v2508_v54  ;;  %1291 = vmatpush1.bf16.msra.mxu1 %v2511_v15 }
 0x52d   :  { %1251 = vmatprep.subr.bf16.mxu0 %v2514_v16  ;;  %1292 = vmatprep.subr.bf16.mxu1 %v2517_v17 }
 0x530   :  { %1252 = vmatpush1.bf16.msra.mxu0 %v2520_v18  ;;  %1293 = vmatpush1.bf16.msra.mxu1 %v2523_v20 }
 0x531   :  { %1253 = vmatprep.subr.bf16.mxu0 %v2115_v40  ;;  %1294 = vmatprep.subr.bf16.mxu1 %v2117_v41 }
 0x534   :  { %1254 = vmatpush1.bf16.msra.mxu0 %v2121_v42  ;;  %1295 = vmatpush1.bf16.msra.mxu1 %v2123_v43  ;;  %v2692_v43 = vld [vmem:[#allocation16_spill] sm:$0xff] }
 0x535   :  { %1255 = vmatprep.subr.bf16.mxu0 %v2134_v45  ;;  %1296 = vmatprep.subr.bf16.mxu1 %v2136_v46 }
 0x538   :  { %1256 = vmatpush1.bf16.msra.mxu0 %v2140_v47  ;;  %1297 = vmatpush1.bf16.msra.mxu1 %v2142_v48  ;;  %v2693_v48 = vld [vmem:[#allocation15_spill] sm:$0xff] }
 0x539   :  { %1356 = vmatprep.subr.bf16.mxu0 %v2444_v12  ;;  %1397 = vmatprep.subr.bf16.mxu1 %v2447_v13  ;;  %v2694_v13 = vld [vmem:[#allocation17_spill] sm:$0xff] }
 0x5db   :  { %v1160_v21 = vpop.f32.mrf.mxu0  ;;  %v1201_v40 = vpop.f32.mrf.mxu1 }
 0x5dc   :  { %v1212_v41 = vadd.f32 %v1160_v21, %v2691_v22  ;;  %v1214_v12 = vadd.f32 %v1201_v40, %v2693_v48 }
 0x5dd   :  { %v1162_v23 = vpop.f32.mrf.mxu0  ;;  %v1203_v42 = vpop.f32.mrf.mxu1 }
 0x5de   :  { %v1634_v25 = vmul.f32 -1.442695, %v1212_v41  ;;  %v1213_v26 = vadd.f32 %v1162_v23, %v2692_v43  ;;  %v1636_v30 = vmul.f32 -1.442695, %v1214_v12  ;;  %v1215_v31 = vadd.f32 %v1203_v42, %v2694_v13  ;;  %v1485_v13 = vld [vmem:[%s2656_s4 + $0x70] sm:$0xff] }
 0x5df   :  { %v1164_v45 = vpop.f32.mrf.mxu0  ;;  %v1205_v27 = vpop.f32.mrf.mxu1 }
 0x5e0   :  { %1830 = vpow2.f32 %v1634_v25  ;;  %v1635_v46 = vmul.f32 -1.442695, %v1213_v26 }
 0x5e1   :  { %v1165_v47 = vpop.f32.mrf.mxu0  ;;  %v1206_v28 = vpop.f32.mrf.mxu1 }
 0x5e2   :  { %1832 = vpow2.f32 %v1635_v46 }
 0x5e3   :  { %1834 = vpow2.f32 %v1636_v30  ;;  %v1486_v30 = vld [vmem:[%s2656_s4 + $0x78] sm:$0xff] }
 0x5e4   :  { %1836 = vtanh.f32 %v1215_v31  ;;  %v1484_v31 = vld [vmem:[%s2656_s4 + $0x68] sm:$0xff] }
 0x5ed   :  { %v1831_v32 = vpop.eup %1830 }
 0x5ee   :  { %v1225_v33 = vadd.f32 1.0, %v1831_v32  ;;  %v1483_v32 = vld [vmem:[%s2656_s4 + $0x60] sm:$0xff] }
 0x5ef   :  { %v1833_v35 = vpop.eup %1832 }
 0x5f0   :  { %1838 = vrcp.f32 %v1225_v33  ;;  %v1226_v36 = vadd.f32 1.0, %v1833_v35  ;;  %v1835_v37 = vpop.eup %1834  ;;  %v1482_v33 = vld [vmem:[%s2656_s4 + $0x58] sm:$0xff]  ;;  %v1481_v35 = vld [vmem:[%s2656_s4 + $0x50] sm:$0xff] }
 0x5f1   :  { %v1837_v38 = vpop.eup %1836  ;;  %v1227_v53 = vadd.f32 1.0, %v1835_v37  ;;  %v1479_v37 = vld [vmem:[%s2656_s4 + $0x40] sm:$0xff] }
 0x5f2   :  { %1840 = vrcp.f32 %v1226_v36  ;;  %v1480_v36 = vld [vmem:[%s2656_s4 + $0x48] sm:$0xff] }
 0x5f3   :  { %1842 = vrcp.f32 %v1227_v53  ;;  %v1474_v53 = vld [vmem:[%s2656_s4 + $0x18] sm:$0xff] }
 0x5fd   :  { %v1839_v29 = vpop.eup %1838 }
 0x5fe   :  { %v1236_v63 = vmul.f32 %v1839_v29, %v1837_v38  ;;  %v1478_v38 = vld [vmem:[%s2656_s4 + $0x38] sm:$0xff]  ;;  %v1477_v29 = vld [vmem:[%s2656_s4 + $0x30] sm:$0xff] }
 0x5ff   :  { %v1841_v14 = vpop.eup %1840 }
 0x600   :  { %v1235_v51 = vmul.f32 %v1841_v14, %v2455_v8  ;;  %v1843_v56 = vpop.eup %1842  ;;  %v1903_v8 = vld [vmem:[#allocation3 + $0x2c] ss:$16 sps:$4 sm:$0xff]   ;;  %v1475_v14 = vld [vmem:[%s2656_s4 + $0x20] sm:$0xff] }
 0x602   :  { %v2541_v6 = vadd.f32 %v1236_v63, %v1235_v51  ;;  %v1476_v63 = vld [vmem:[%s2656_s4 + $0x28] sm:$0xff]  ;;  %v1473_v51 = vld [vmem:[%s2656_s4 + $0x10] sm:$0xff] }
 0x604   :  { %1844 = vtanh.f32 %v2541_v6 }
 0x611   :  { %v1845_v49 = vpop.eup %1844 }
 0x612   :  { %v1239_v4 = vmul.f32 %v1845_v49, %v1843_v56  ;;  %v1471_v56 = vld [vmem:[%s2656_s4] sm:$0xff] }
 0x614   :  { %v1240_v60 = vpack.c.bf16 %v1239_v4, %v1239_v4 }
 0x616   :  { %1274 = vmatmul.mubr.bf16.vlgmr.msra.gmra.mxu0 %v1240_v60  ;;  %1315 = vmatmul.mubr.bf16.vlgmr.msra.gmra.mxu1 %v1240_v60  ;;  %v2700_v60 = vld [vmem:[#allocation22_spill] sm:$0xff] }
 0x617   :  { %1357 = vmatpush1.bf16.msra.mxu0 %v2458_v24  ;;  %1398 = vmatpush1.bf16.msra.mxu1 %v2461_v58  ;;  %v1908_v24 = vld [vmem:[#allocation3] ss:$16 sps:$4 sm:$0xff]   ;;  %v1909_v58 = vld [vmem:[#allocation3 + $0x8] ss:$16 sps:$4 sm:$0xff]  }
 0x618   :  { %1358 = vmatprep.subr.bf16.mxu0 %v2464_v44  ;;  %1399 = vmatprep.subr.bf16.mxu1 %v2467_v7  ;;  %v2695_v44 = vmov 0.0  }
 0x619   :  { %1388 = vmatprep.mubr.bf16.mxu0 %v2682_v1  ;;  %1429 = vmatprep.mubr.bf16.mxu1 %v2682_v1  ;;  %v1902_v1 = vld [vmem:[#allocation3 + $0x24] ss:$16 sps:$4 sm:$0xff]  }
 0x61b   :  { %1359 = vmatpush1.bf16.msra.mxu0 %v2472_v55  ;;  %1400 = vmatpush1.bf16.msra.mxu1 %v2475_v61  ;;  %v2696_v61 = vld [vmem:[#allocation18_spill] sm:$0xff] }
 0x61c   :  { %1360 = vmatprep.subr.bf16.mxu0 %v2478_v9  ;;  %1401 = vmatprep.subr.bf16.mxu1 %v2481_v19 }
 0x61f   :  { %1361 = vmatpush1.bf16.msra.mxu0 %v2484_v59  ;;  %1402 = vmatpush1.bf16.msra.mxu1 %v2487_v50 }
 0x620   :  { %1362 = vmatprep.subr.bf16.mxu0 %v2490_v2  ;;  %1403 = vmatprep.subr.bf16.mxu1 %v2493_v62  ;;  %v2697_v2 = vld [vmem:[#allocation20_spill] sm:$0xff] }
 0x623   :  { %1363 = vmatpush1.bf16.msra.mxu0 %v2496_v39  ;;  %1404 = vmatpush1.bf16.msra.mxu1 %v2499_v5 }
 0x624   :  { %1364 = vmatprep.subr.bf16.mxu0 %v2502_v52  ;;  %1405 = vmatprep.subr.bf16.mxu1 %v2505_v57 }
 0x627   :  { %1365 = vmatpush1.bf16.msra.mxu0 %v2508_v54  ;;  %1406 = vmatpush1.bf16.msra.mxu1 %v2511_v15  ;;  %v2698_v15 = vld [vmem:[#allocation19_spill] sm:$0xff] }
 0x628   :  { %1366 = vmatprep.subr.bf16.mxu0 %v2514_v16  ;;  %1407 = vmatprep.subr.bf16.mxu1 %v2517_v17 }
 0x62b   :  { %1367 = vmatpush1.bf16.msra.mxu0 %v2520_v18  ;;  %1408 = vmatpush1.bf16.msra.mxu1 %v2523_v20  ;;  %v2699_v18 = vld [vmem:[#allocation21_spill] sm:$0xff] }
 0x62c   :  { %1368 = vmatprep.subr.bf16.mxu0 %v1902_v1  ;;  %1409 = vmatprep.subr.bf16.mxu1 %v1903_v8 }
 0x62f   :  { %1369 = vmatpush1.bf16.msra.mxu0 %v1904_v3  ;;  %1410 = vmatpush1.bf16.msra.mxu1 %v1905_v10 }
 0x630   :  { %1370 = vmatprep.subr.bf16.mxu0 %v1906_v0  ;;  %1411 = vmatprep.subr.bf16.mxu1 %v1907_v11  ;;  %v2701_v0 = vld [vmem:[#allocation24_spill] sm:$0xff] }
 0x633   :  { %1371 = vmatpush1.bf16.msra.mxu0 %v1908_v24  ;;  %1412 = vmatpush1.bf16.msra.mxu1 %v1909_v58 }
 0x634   :  { %1661 = vmatprep.subr.mxu0 %v2695_v44 }
 0x6d6   :  { %v1275_v7 = vpop.f32.mrf.mxu0  ;;  %v1316_v55 = vpop.f32.mrf.mxu1 }
 0x6d7   :  { %v1327_v9 = vadd.f32 %v1275_v7, %v2696_v61  ;;  %v1329_v16 = vadd.f32 %v1316_v55, %v2698_v15 }
 0x6d8   :  { %v1277_v19 = vpop.f32.mrf.mxu0  ;;  %v1318_v59 = vpop.f32.mrf.mxu1 }
 0x6d9   :  { %v1637_v50 = vmul.f32 -1.442695, %v1327_v9  ;;  %v1328_v62 = vadd.f32 %v1277_v19, %v2697_v2  ;;  %v1639_v17 = vmul.f32 -1.442695, %v1329_v16  ;;  %v1330_v20 = vadd.f32 %v1318_v59, %v2699_v18  ;;  %v2702_v9 = vld [vmem:[#allocation23_spill] sm:$0xff] }
 0x6da   :  { %v1279_v39 = vpop.f32.mrf.mxu0  ;;  %v1320_v5 = vpop.f32.mrf.mxu1 }
 0x6db   :  { %1846 = vpow2.f32 %v1637_v50  ;;  %v1638_v52 = vmul.f32 -1.442695, %v1328_v62 }
 0x6dc   :  { %v1280_v57 = vpop.f32.mrf.mxu0  ;;  %v1321_v54 = vpop.f32.mrf.mxu1 }
 0x6dd   :  { %1848 = vpow2.f32 %v1638_v52 }
 0x6de   :  { %1850 = vpow2.f32 %v1639_v17 }
 0x6df   :  { %1852 = vtanh.f32 %v1330_v20 }
 0x6e8   :  { %v1847_v21 = vpop.eup %1846 }
 0x6e9   :  { %v1340_v40 = vadd.f32 1.0, %v1847_v21 }
 0x6ea   :  { %v1849_v22 = vpop.eup %1848 }
 0x6eb   :  { %1854 = vrcp.f32 %v1340_v40  ;;  %v1341_v41 = vadd.f32 1.0, %v1849_v22  ;;  %v1851_v23 = vpop.eup %1850  ;;  %v1643_v22 = vld [vmem:[%s2657_s5] ss:$0 sm:$0xff] }
 0x6ec   :  { %v1853_v42 = vpop.eup %1852  ;;  %v1342_v45 = vadd.f32 1.0, %v1851_v23 }
 0x6ed   :  { %1856 = vrcp.f32 %v1341_v41 }
 0x6ee   :  { %1858 = vrcp.f32 %v1342_v45 }
 0x6f8   :  { %v1855_v25 = vpop.eup %1854 }
 0x6f9   :  { %v1351_v43 = vmul.f32 %v1855_v25, %v1853_v42 }
 0x6fa   :  { %v1857_v26 = vpop.eup %1856 }
 0x6fb   :  { %v1350_v27 = vmul.f32 %v1857_v26, %v2541_v6  ;;  %v1859_v47 = vpop.eup %1858  ;;  %v1472_v6 = vld [vmem:[%s2656_s4 + $0x8] sm:$0xff] }
 0x6fd   :  { %v2574_v46 = vadd.f32 %v1351_v43, %v1350_v27 }
 0x6ff   :  { %1860 = vtanh.f32 %v2574_v46 }
 0x70c   :  { %v1861_v28 = vpop.eup %1860 }
 0x70d   :  { %v1354_v48 = vmul.f32 %v1861_v28, %v1859_v47 }
 0x70f   :  { %v1355_v12 = vpack.c.bf16 %v1354_v48, %v1354_v48 }
 0x711   :  { %1389 = vmatmul.mubr.bf16.vlgmr.msra.gmra.mxu0 %v1355_v12  ;;  %1430 = vmatmul.mubr.bf16.vlgmr.msra.gmra.mxu1 %v1355_v12 }
 0x712   :  { %1662 = vmatpush3.msra.mxu0 %v1486_v30  ;;  %1693 = vmatprep.mubr.msk.f32.mxu0 %vm1937_vm1, %v2695_v44 }
 0x713   :  { %1663 = vmatprep.subr.mxu0 %v2695_v44 }
 0x714   :  { %1664 = vmatpush3.msra.mxu0 %v1485_v13 }
 0x715   :  { %1665 = vmatprep.subr.mxu0 %v2695_v44 }
 0x716   :  { %1666 = vmatpush3.msra.mxu0 %v1484_v31 }
 0x717   :  { %1667 = vmatprep.subr.mxu0 %v2695_v44 }
 0x718   :  { %1668 = vmatpush3.msra.mxu0 %v1483_v32 }
 0x719   :  { %1669 = vmatprep.subr.mxu0 %v2695_v44 }
 0x71a   :  { %1670 = vmatpush3.msra.mxu0 %v1482_v33 }
 0x71b   :  { %1671 = vmatprep.subr.mxu0 %v2695_v44 }
 0x71c   :  { %1672 = vmatpush3.msra.mxu0 %v1481_v35 }
 0x71d   :  { %1673 = vmatprep.subr.mxu0 %v2695_v44 }
 0x71e   :  { %1674 = vmatpush3.msra.mxu0 %v1480_v36 }
 0x71f   :  { %1675 = vmatprep.subr.mxu0 %v2695_v44 }
 0x720   :  { %1676 = vmatpush3.msra.mxu0 %v1479_v37 }
 0x721   :  { %1677 = vmatprep.subr.mxu0 %v2695_v44 }
 0x722   :  { %1678 = vmatpush3.msra.mxu0 %v1478_v38 }
 0x723   :  { %1679 = vmatprep.subr.mxu0 %v2695_v44 }
 0x724   :  { %1680 = vmatpush3.msra.mxu0 %v1477_v29 }
 0x725   :  { %1681 = vmatprep.subr.mxu0 %v2695_v44 }
 0x726   :  { %1682 = vmatpush3.msra.mxu0 %v1476_v63 }
 0x727   :  { %1683 = vmatprep.subr.mxu0 %v2695_v44 }
 0x728   :  { %1684 = vmatpush3.msra.mxu0 %v1475_v14 }
 0x729   :  { %1685 = vmatprep.subr.mxu0 %v2695_v44 }
 0x72a   :  { %1686 = vmatpush3.msra.mxu0 %v1474_v53 }
 0x72b   :  { %1687 = vmatprep.subr.mxu0 %v2695_v44 }
 0x72c   :  { %1688 = vmatpush3.msra.mxu0 %v1473_v51 }
 0x72d   :  { %1689 = vmatprep.subr.mxu0 %v2695_v44 }
 0x72e   :  { %1690 = vmatpush3.msra.mxu0 %v1472_v6 }
 0x72f   :  { %1691 = vmatprep.subr.mxu0 %v2695_v44 }
 0x730   :  { %1692 = vmatpush3.msra.mxu0 %v1471_v56 }
 0x7d1   :  { %v1390_v49 = vpop.f32.mrf.mxu0  ;;  %v1431_v4 = vpop.f32.mrf.mxu1 }
 0x7d2   :  { %v1442_v1 = vadd.f32 %v1390_v49, %v2700_v60  ;;  %v1444_v19 = vadd.f32 %v1431_v4, %v2702_v9 }
 0x7d3   :  { %v1392_v8 = vpop.f32.mrf.mxu0  ;;  %v1433_v3 = vpop.f32.mrf.mxu1 }
 0x7d4   :  { %v1640_v10 = vmul.f32 -1.442695, %v1442_v1  ;;  %v1443_v11 = vadd.f32 %v1392_v8, %v2701_v0  ;;  %v1642_v44 = vmul.f32 -1.442695, %v1444_v19  ;;  %v1445_v59 = vadd.f32 %v1433_v3, %v2275_v34 }
 0x7d5   :  { %v1394_v24 = vpop.f32.mrf.mxu0  ;;  %v1435_v58 = vpop.f32.mrf.mxu1 }
 0x7d6   :  { %1862 = vpow2.f32 %v1640_v10  ;;  %v1641_v7 = vmul.f32 -1.442695, %v1443_v11 }
 0x7d7   :  { %v1395_v55 = vpop.f32.mrf.mxu0  ;;  %v1436_v61 = vpop.f32.mrf.mxu1 }
 0x7d8   :  { %1864 = vpow2.f32 %v1641_v7 }
 0x7d9   :  { %1866 = vpow2.f32 %v1642_v44 }
 0x7da   :  { %1868 = vtanh.f32 %v1445_v59 }
 0x7e3   :  { %v1863_v50 = vpop.eup %1862 }
 0x7e4   :  { %v1455_v2 = vadd.f32 1.0, %v1863_v50 }
 0x7e5   :  { %v1865_v62 = vpop.eup %1864 }
 0x7e6   :  { %1870 = vrcp.f32 %v1455_v2  ;;  %v1456_v39 = vadd.f32 1.0, %v1865_v62  ;;  %v1867_v5 = vpop.eup %1866 }
 0x7e7   :  { %v1869_v52 = vpop.eup %1868  ;;  %v1457_v16 = vadd.f32 1.0, %v1867_v5 }
 0x7e8   :  { %1872 = vrcp.f32 %v1456_v39 }
 0x7e9   :  { %1874 = vrcp.f32 %v1457_v16 }
 0x7f3   :  { %v1871_v57 = vpop.eup %1870 }
 0x7f4   :  { %v1466_v54 = vmul.f32 %v1871_v57, %v1869_v52 }
 0x7f5   :  { %v1873_v15 = vpop.eup %1872 }
 0x7f6   :  { %v1465_v17 = vmul.f32 %v1873_v15, %v2574_v46  ;;  %v1875_v34 = vpop.eup %1874 }
 0x7f8   :  { %v1467_v18 = vadd.f32 %v1466_v54, %v1465_v17 }
 0x7fa   :  { %1876 = vtanh.f32 %v1467_v18 }
 0x807   :  { %v1877_v20 = vpop.eup %1876 }
 0x808   :  { %v1469_v21 = vmul.f32 %v1877_v20, %v1875_v34 }
 0x80a   :  { %v1470_v40 = vmax.f32 %v1469_v21, 0.0 }
 0x80c   :  { %1694 = vmatmul.mubr.f32.vlgmr.msra.gmra.mxu0 %v1470_v40 }
 0x8cc   :  { %v1560_v41 = vpop.f32.mrf.mxu0 }
 0x8cd   :  { %v1561_v23 = vadd.f32 %v1643_v22, %v1560_v41 }
 0x8ce   :  { %v1695_v42 = vpop.f32.mrf.mxu0 }
 0x8cf   :  { %1565 = vst.msk [vmem:[%s2658_s6] sm:$0xff] %vm1564_vm2, %v1561_v23 }
 0x8d0   :  { %1570 = vsyncpa [#allocation4], 1 }

</bundles_post_ra>
